<compile_context>
chip_gen: v6e
topology: v6e:2x2x1
jax: 0.10.0
libtpu: 0.0.40
codegen_flags: <defaults>
</compile_context>

<pallas_src>
import functools

import jax
import jax.numpy as jnp
from jax import lax
from jax.experimental import pallas as pl
from jax.experimental.pallas import tpu as pltpu

KSIZE = 5        # Conv2d kernel_size=5, stride=1, no padding
BT = 4           # batch rows (images) per conv grid step
TK_MAX = 6144    # max K-tile (feature dim) for the l1 matmul (48*128)


def _round_up(x, m):
    return ((x + m - 1) // m) * m


def conv_pool_kernel(x_ref, band_ref, cb_ref, rsel_ref, csel_ref, o_ref):
    """relu(conv5x5(x) + b) followed by MaxPool2d(2, 2), fused.

    x_ref:    (BT, H, W)    VMEM bf16 -- padded embedding images (H=max_size, W=embed_dim)
    band_ref: (5, W, OW)    VMEM bf16 -- banded column-conv weights, band[di, c+dj, c] = w[di, dj]
    cb_ref:   (1,)          SMEM f32  -- conv1 bias
    rsel_ref: (PH, OH-1)    VMEM bf16 -- row-decimation 0/1 matrix, rsel[p, 2p] = 1
    csel_ref: (OW-1, PW)    VMEM bf16 -- col-decimation 0/1 matrix, csel[2q, q] = 1
    o_ref:    (BT, PH, PW)  VMEM bf16 -- pooled output
    """
    x = x_ref[...]
    bt, H, W = x.shape
    OH, OW = H - (KSIZE - 1), W - (KSIZE - 1)
    PH, PW = OH // 2, OW // 2

    # 5x5 valid conv on the MXU: column taps are inside the band matrices, row taps
    # are 5 sublane-shifted LHS feeds; accumulate in f32 (5 matmuls, not 25 VPU passes).
    acc = jnp.zeros((bt * OH, OW), jnp.float32)
    for di in range(KSIZE):
        xs = x[:, di:di + OH, :].reshape(bt * OH, W)                 # sublane shift only
        acc = acc + jnp.dot(xs, band_ref[di],
                            preferred_element_type=jnp.float32)
    acc = jnp.maximum(acc + cb_ref[0], 0.0).reshape(bt, OH, OW)      # bias + ReLU (f32, VPU)

    # MaxPool2d(2, 2): vertical pair max, then row-decimate BEFORE the horizontal max
    # so the remaining work runs on PH rows instead of OH-1.  Decimations are 0/1
    # selection matmuls (lane/sublane-dense, no strided slices); values are cast to
    # bf16 only at selection points (exact: each output is a single value * 1).
    vmax = jnp.maximum(acc[:, 0:OH - 1, :], acc[:, 1:OH, :]).astype(jnp.bfloat16)
    for b in range(bt):
        rdec = jnp.dot(rsel_ref[...], vmax[b],
                       preferred_element_type=jnp.float32)           # (PH, OW) f32
        hmax = jnp.maximum(rdec[:, 0:OW - 1], rdec[:, 1:OW]).astype(jnp.bfloat16)
        o_ref[b] = jnp.dot(hmax, csel_ref[...],
                           preferred_element_type=jnp.float32).astype(o_ref.dtype)


def mlp_kernel(x_ref, w1_ref, b1_ref, w2_ref, o_ref, acc_ref):
    """Fused l1 -> l2 (no activation between them, matching the PyTorch module).

    Grid = (hidden splits NH, K tiles KT).  Axis 1 ("arbitrary") tiles the l1
    contraction dim: w1 streams in (TK, HID/NH) bf16 blocks into an f32 VMEM scratch.
    Axis 0 ("parallel") splits the hidden dim across TensorCores (v7x); the
    (NH, Bp, OUT) partial outputs are summed (and b2 added) by the caller.
    """
    k = pl.program_id(1)

    @pl.when(k == 0)
    def _():
        acc_ref[...] = jnp.zeros_like(acc_ref)

    acc_ref[...] += jnp.dot(x_ref[...], w1_ref[...],
                            preferred_element_type=jnp.float32)

    @pl.when(k == pl.num_programs(1) - 1)
    def _():
        h = acc_ref[...] + b1_ref[...]                               # (Bp, HID/NH) f32
        o_ref[0] = jnp.dot(h, w2_ref[...],
                           preferred_element_type=jnp.float32).astype(o_ref.dtype)


def prepare_mlp_weight(w1):
    """One-time prep: cast l1 weight to bf16 and zero-pad its feature (K) dim to a
    multiple of the K tile so the Pallas grid has no ragged tile."""
    feat, hid = w1.shape
    tk = TK_MAX if feat > TK_MAX else _round_up(feat, 128)
    feat_p = _round_up(feat, tk)
    w1p = jnp.zeros((feat_p, hid), jnp.bfloat16).at[:feat, :].set(w1.astype(jnp.bfloat16))
    return w1p, tk


def simple_cnn_forward(tokens, params, *, max_size):
    embed = params["embed"]         # (vocab, D) f32
    conv_w = params["conv_w"]       # (5, 5) f32
    conv_b = params["conv_b"]       # (1,) f32
    w1p = params["w1_padded"]       # (FEAT_p, HID) bf16 (from prepare_mlp_weight)
    b1, b2 = params["b1"], params["b2"]   # (1, HID), (1, OUT) f32
    w2 = params["w2"]               # (HID, OUT) f32

    seq_len, batch = tokens.shape
    D = embed.shape[1]
    H, W = max_size, D
    OH, OW = H - (KSIZE - 1), W - (KSIZE - 1)
    PH, PW = OH // 2, OW // 2
    FEAT = PH * PW
    FEAT_p, HID = w1p.shape
    OUT = w2.shape[1]
    TK = TK_MAX if FEAT > TK_MAX else _round_up(FEAT, 128)
    KT = FEAT_p // TK
    # hidden-dim splits: 2 lets a dual-TC part (v7x) run both halves in parallel;
    # falls back to 1 when HID/2 is not lane-aligned.  Costs only a few extra grid
    # steps on single-TC parts (v5e/v6e).
    NH = 2 if (HID % 2 == 0 and (HID // 2) % 128 == 0) else 1
    HIDH = HID // NH

    # --- glue: embedding lookup + zero-padding (reproduces the PyTorch indexing,
    #     including the `seq_len - 1` truncation).  Batch padded to Bp >= 8 and a
    #     multiple of BT; images carried in bf16 (MXU-native on every generation).
    # TODO(synk): fusing the embedding gather + zero-pad into the conv kernel via
    # scalar-prefetched token ids / manual DMA gather is left as XLA glue here.
    emb = embed[tokens]                          # (seq, batch, D)
    emb = jnp.transpose(emb, (1, 0, 2))          # (batch, seq, D) == permute(1, 0, 2)
    s = min(seq_len - 1, max_size)
    Bp = max(8, _round_up(batch, BT))
    padded = jnp.zeros((Bp, H, W), jnp.bfloat16).at[:batch, :s, :].set(
        emb[:, :s, :].astype(jnp.bfloat16))

    # Banded column-conv weights: band[di, c + dj, c] = conv_w[di, dj].
    diff = jnp.arange(W)[:, None] - jnp.arange(OW)[None, :]          # (W, OW)
    in_band = (diff >= 0) & (diff < KSIZE)
    band = jnp.stack([
        jnp.where(in_band, conv_w[di][jnp.clip(diff, 0, KSIZE - 1)], 0.0)
        for di in range(KSIZE)]).astype(jnp.bfloat16)                # (5, W, OW)

    # 0/1 stride-2 selection matrices for the fused max-pool decimation.
    rsel = (jnp.arange(OH - 1)[None, :] == 2 * jnp.arange(PH)[:, None]).astype(jnp.bfloat16)
    csel = (jnp.arange(OW - 1)[:, None] == 2 * jnp.arange(PW)[None, :]).astype(jnp.bfloat16)

    # --- Pallas kernel 1: conv(5x5) + ReLU + MaxPool2d(2,2), BT images per grid step ---
    pooled = pl.pallas_call(
        conv_pool_kernel,
        out_shape=jax.ShapeDtypeStruct((Bp, PH, PW), jnp.bfloat16),
        grid=(Bp // BT,),
        in_specs=[
            pl.BlockSpec((BT, H, W), lambda i: (i, 0, 0)),
            pl.BlockSpec((KSIZE, W, OW), lambda i: (0, 0, 0)),       # band (resident)
            pl.BlockSpec(memory_space=pltpu.MemorySpace.SMEM),       # conv bias
            pl.BlockSpec((PH, OH - 1), lambda i: (0, 0)),            # rsel (resident)
            pl.BlockSpec((OW - 1, PW), lambda i: (0, 0)),            # csel (resident)
        ],
        out_specs=pl.BlockSpec((BT, PH, PW), lambda i: (i, 0, 0)),
        compiler_params=pltpu.CompilerParams(
            dimension_semantics=("parallel",),
            vmem_limit_bytes=32 * 1024 * 1024),
    )(padded, band, conv_b, rsel, csel)

    # TODO(synk): Dropout(0.5) implemented as identity (eval-mode semantics);
    # PyTorch training-mode dropout RNG is not reproducible here.
    flat = pooled.reshape(Bp, FEAT)                                  # == .view(batch, -1), bf16
    flat_p = jnp.zeros((Bp, FEAT_p), jnp.bfloat16).at[:, :FEAT].set(flat)

    # --- Pallas kernel 2: l1 -> l2, (hidden split, K tile) grid, bf16-streamed w1 ---
    partial_out = pl.pallas_call(
        mlp_kernel,
        out_shape=jax.ShapeDtypeStruct((NH, Bp, OUT), jnp.float32),
        grid=(NH, KT),
        in_specs=[
            pl.BlockSpec((Bp, TK), lambda h, k: (0, k)),
            pl.BlockSpec((TK, HIDH), lambda h, k: (k, h)),
            pl.BlockSpec((1, HIDH), lambda h, k: (0, h)),
            pl.BlockSpec((HIDH, OUT), lambda h, k: (h, 0)),
        ],
        out_specs=pl.BlockSpec((1, Bp, OUT), lambda h, k: (h, 0, 0)),
        scratch_shapes=[pltpu.VMEM((Bp, HIDH), jnp.float32)],
        compiler_params=pltpu.CompilerParams(
            dimension_semantics=("parallel", "arbitrary"),
            vmem_limit_bytes=24 * 1024 * 1024),
    )(flat_p, w1p, b1, w2)

    out = partial_out.sum(axis=0) + b2                               # b2 added once
    return out[:batch]


if __name__ == "__main__":
    # small shapes consistent with the module (original uses max_size=500, embed_dim=300,
    # which give the hard-coded 248*148 l1 input; everything here is parametric).
    VOCAB, D, MAX_SIZE = 50, 16, 20
    SEQ, BATCH = 12, 2
    HIDDEN, OUT = 512, 90

    H, W = MAX_SIZE, D
    OH, OW = H - (KSIZE - 1), W - (KSIZE - 1)
    PH, PW = OH // 2, OW // 2
    FEAT = PH * PW * 1   # num_output_channels = 1

    key = jax.random.PRNGKey(0)
    ks = jax.random.split(key, 8)
    params_f32 = {
        "embed":  jax.random.normal(ks[0], (VOCAB, D), jnp.float32),
        "conv_w": 0.1 * jax.random.normal(ks[1], (KSIZE, KSIZE), jnp.float32),
        "conv_b": 0.1 * jax.random.normal(ks[2], (1,), jnp.float32),
        "w1":     0.05 * jax.random.normal(ks[3], (FEAT, HIDDEN), jnp.float32),
        "b1":     0.05 * jax.random.normal(ks[4], (1, HIDDEN), jnp.float32),
        "w2":     0.05 * jax.random.normal(ks[5], (HIDDEN, OUT), jnp.float32),
        "b2":     0.05 * jax.random.normal(ks[6], (1, OUT), jnp.float32),
    }
    # module expects token indices of shape (seq_len, batch)
    tokens = jax.random.randint(ks[7], (SEQ, BATCH), 0, VOCAB, dtype=jnp.int32)

    # one-time weight prep (bf16 cast + K-tile padding of w1)
    w1p, _ = prepare_mlp_weight(params_f32["w1"])
    params = dict(params_f32)
    del params["w1"]
    params["w1_padded"] = w1p

    fwd = jax.jit(functools.partial(simple_cnn_forward, max_size=MAX_SIZE))
    out = jax.block_until_ready(fwd(tokens, params))
    assert out.shape == (BATCH, OUT) and out.dtype == jnp.float32

    # pure-JAX reference (same bf16 cast points as the kernels)
    emb = params_f32["embed"][tokens].transpose(1, 0, 2)
    s = min(SEQ - 1, MAX_SIZE)
    padded_ref = jnp.zeros((BATCH, MAX_SIZE, D), jnp.bfloat16).at[:, :s, :].set(
        emb[:, :s, :].astype(jnp.bfloat16))
    conv = lax.conv_general_dilated(
        padded_ref.astype(jnp.float32)[:, None, :, :],
        params_f32["conv_w"].astype(jnp.bfloat16).astype(jnp.float32)[None, None, :, :],
        window_strides=(1, 1), padding="VALID",
        dimension_numbers=("NCHW", "OIHW", "NCHW"))[:, 0] + params_f32["conv_b"][0]
    conv = jnp.maximum(conv, 0.0)
    pooled_ref = lax.reduce_window(conv, -jnp.inf, lax.max, (1, 2, 2), (1, 2, 2), "VALID")
    flat_ref = pooled_ref.astype(jnp.bfloat16).reshape(BATCH, -1)
    h_ref = jnp.dot(flat_ref, params_f32["w1"].astype(jnp.bfloat16),
                    preferred_element_type=jnp.float32) + params_f32["b1"]
    ref = jnp.dot(h_ref, params_f32["w2"], preferred_element_type=jnp.float32) + params_f32["b2"]
    assert jnp.allclose(out, ref, atol=2e-2, rtol=2e-2), "kernel/reference mismatch"

    print("KERNEL_OK")
</pallas_src>

<mosaic_0001>
module attributes {stable_mosaic.version = 11 : i64} {
  func.func @conv_pool_kernel(%arg0: i32, %arg1: memref<4x20x16xbf16, #tpu.memory_space<vmem>>, %arg2: memref<5x16x12xbf16, #tpu.memory_space<vmem>>, %arg3: memref<1xf32, #tpu.memory_space<smem>>, %arg4: memref<8x15xbf16, #tpu.memory_space<vmem>>, %arg5: memref<11x6xbf16, #tpu.memory_space<vmem>>, %arg6: memref<4x8x6xbf16, #tpu.memory_space<vmem>>) attributes {dimension_semantics = [#tpu.dimension_semantics<parallel>], iteration_bounds = array<i64: 2>, scalar_prefetch = 0 : i64, scratch_operands = 0 : i64, tpu.core_type = #tpu.core_type<tc>, window_params = [{transform_indices = @transform_0, window_bounds = array<i64: 4, 20, 16>}, {pipeline_mode = #tpu.pipeline_mode<synchronous>, transform_indices = @transform_1, window_bounds = array<i64: 5, 16, 12>}, {transform_indices = @transform_2, window_bounds = array<i64: 1>}, {pipeline_mode = #tpu.pipeline_mode<synchronous>, transform_indices = @transform_3, window_bounds = array<i64: 8, 15>}, {pipeline_mode = #tpu.pipeline_mode<synchronous>, transform_indices = @transform_4, window_bounds = array<i64: 11, 6>}, {transform_indices = @transform_5, window_bounds = array<i64: 4, 8, 6>}]} {
    %c0 = arith.constant 0 : index
    %c0_0 = arith.constant 0 : index
    %c0_1 = arith.constant 0 : index
    %0 = vector.load %arg1[%c0, %c0_0, %c0_1] : memref<4x20x16xbf16, #tpu.memory_space<vmem>>, vector<4x20x16xbf16>
    %cst = arith.constant 0.000000e+00 : f32
    %1 = vector.broadcast %cst : f32 to vector<64x12xf32>
    %2 = vector.extract_strided_slice %0 {offsets = [0, 0, 0], sizes = [4, 16, 16], strides = [1, 1, 1]} : vector<4x20x16xbf16> to vector<4x16x16xbf16>
    %3 = vector.shape_cast %2 : vector<4x16x16xbf16> to vector<64x16xbf16>
    %c0_2 = arith.constant 0 : index
    %c0_3 = arith.constant 0 : index
    %c0_4 = arith.constant 0 : index
    %4 = vector.load %arg2[%c0_2, %c0_3, %c0_4] : memref<5x16x12xbf16, #tpu.memory_space<vmem>>, vector<1x16x12xbf16>
    %5 = vector.shape_cast %4 : vector<1x16x12xbf16> to vector<16x12xbf16>
    %cst_5 = arith.constant dense<0.000000e+00> : vector<64x12xf32>
    %6 = tpu.matmul %3, %5, %cst_5 {dimension_numbers = #tpu.dot_dimension_numbers<[1], [0], [0], [1], [0, 0, 1, 1], [], []>} : vector<64x16xbf16>, vector<16x12xbf16>, vector<64x12xf32> -> vector<64x12xf32>
    %7 = arith.addf %1, %6 : vector<64x12xf32>
    %8 = vector.extract_strided_slice %0 {offsets = [0, 1, 0], sizes = [4, 16, 16], strides = [1, 1, 1]} : vector<4x20x16xbf16> to vector<4x16x16xbf16>
    %9 = vector.shape_cast %8 : vector<4x16x16xbf16> to vector<64x16xbf16>
    %c1 = arith.constant 1 : index
    %c0_6 = arith.constant 0 : index
    %c0_7 = arith.constant 0 : index
    %10 = vector.load %arg2[%c1, %c0_6, %c0_7] : memref<5x16x12xbf16, #tpu.memory_space<vmem>>, vector<1x16x12xbf16>
    %11 = vector.shape_cast %10 : vector<1x16x12xbf16> to vector<16x12xbf16>
    %cst_8 = arith.constant dense<0.000000e+00> : vector<64x12xf32>
    %12 = tpu.matmul %9, %11, %cst_8 {dimension_numbers = #tpu.dot_dimension_numbers<[1], [0], [0], [1], [0, 0, 1, 1], [], []>} : vector<64x16xbf16>, vector<16x12xbf16>, vector<64x12xf32> -> vector<64x12xf32>
    %13 = arith.addf %7, %12 : vector<64x12xf32>
    %14 = vector.extract_strided_slice %0 {offsets = [0, 2, 0], sizes = [4, 16, 16], strides = [1, 1, 1]} : vector<4x20x16xbf16> to vector<4x16x16xbf16>
    %15 = vector.shape_cast %14 : vector<4x16x16xbf16> to vector<64x16xbf16>
    %c2 = arith.constant 2 : index
    %c0_9 = arith.constant 0 : index
    %c0_10 = arith.constant 0 : index
    %16 = vector.load %arg2[%c2, %c0_9, %c0_10] : memref<5x16x12xbf16, #tpu.memory_space<vmem>>, vector<1x16x12xbf16>
    %17 = vector.shape_cast %16 : vector<1x16x12xbf16> to vector<16x12xbf16>
    %cst_11 = arith.constant dense<0.000000e+00> : vector<64x12xf32>
    %18 = tpu.matmul %15, %17, %cst_11 {dimension_numbers = #tpu.dot_dimension_numbers<[1], [0], [0], [1], [0, 0, 1, 1], [], []>} : vector<64x16xbf16>, vector<16x12xbf16>, vector<64x12xf32> -> vector<64x12xf32>
    %19 = arith.addf %13, %18 : vector<64x12xf32>
    %20 = vector.extract_strided_slice %0 {offsets = [0, 3, 0], sizes = [4, 16, 16], strides = [1, 1, 1]} : vector<4x20x16xbf16> to vector<4x16x16xbf16>
    %21 = vector.shape_cast %20 : vector<4x16x16xbf16> to vector<64x16xbf16>
    %c3 = arith.constant 3 : index
    %c0_12 = arith.constant 0 : index
    %c0_13 = arith.constant 0 : index
    %22 = vector.load %arg2[%c3, %c0_12, %c0_13] : memref<5x16x12xbf16, #tpu.memory_space<vmem>>, vector<1x16x12xbf16>
    %23 = vector.shape_cast %22 : vector<1x16x12xbf16> to vector<16x12xbf16>
    %cst_14 = arith.constant dense<0.000000e+00> : vector<64x12xf32>
    %24 = tpu.matmul %21, %23, %cst_14 {dimension_numbers = #tpu.dot_dimension_numbers<[1], [0], [0], [1], [0, 0, 1, 1], [], []>} : vector<64x16xbf16>, vector<16x12xbf16>, vector<64x12xf32> -> vector<64x12xf32>
    %25 = arith.addf %19, %24 : vector<64x12xf32>
    %26 = vector.extract_strided_slice %0 {offsets = [0, 4, 0], sizes = [4, 16, 16], strides = [1, 1, 1]} : vector<4x20x16xbf16> to vector<4x16x16xbf16>
    %27 = vector.shape_cast %26 : vector<4x16x16xbf16> to vector<64x16xbf16>
    %c4 = arith.constant 4 : index
    %c0_15 = arith.constant 0 : index
    %c0_16 = arith.constant 0 : index
    %28 = vector.load %arg2[%c4, %c0_15, %c0_16] : memref<5x16x12xbf16, #tpu.memory_space<vmem>>, vector<1x16x12xbf16>
    %29 = vector.shape_cast %28 : vector<1x16x12xbf16> to vector<16x12xbf16>
    %cst_17 = arith.constant dense<0.000000e+00> : vector<64x12xf32>
    %30 = tpu.matmul %27, %29, %cst_17 {dimension_numbers = #tpu.dot_dimension_numbers<[1], [0], [0], [1], [0, 0, 1, 1], [], []>} : vector<64x16xbf16>, vector<16x12xbf16>, vector<64x12xf32> -> vector<64x12xf32>
    %31 = arith.addf %25, %30 : vector<64x12xf32>
    %c0_18 = arith.constant 0 : index
    %32 = memref.load %arg3[%c0_18] : memref<1xf32, #tpu.memory_space<smem>>
    %33 = vector.broadcast %32 : f32 to vector<64x12xf32>
    %34 = arith.addf %31, %33 : vector<64x12xf32>
    %cst_19 = arith.constant 0.000000e+00 : f32
    %35 = vector.broadcast %cst_19 : f32 to vector<64x12xf32>
    %36 = arith.maximumf %34, %35 : vector<64x12xf32>
    %37 = vector.shape_cast %36 : vector<64x12xf32> to vector<4x16x12xf32>
    %38 = vector.extract_strided_slice %37 {offsets = [0, 0, 0], sizes = [4, 15, 12], strides = [1, 1, 1]} : vector<4x16x12xf32> to vector<4x15x12xf32>
    %39 = vector.extract_strided_slice %37 {offsets = [0, 1, 0], sizes = [4, 15, 12], strides = [1, 1, 1]} : vector<4x16x12xf32> to vector<4x15x12xf32>
    %40 = arith.maximumf %38, %39 : vector<4x15x12xf32>
    %41 = arith.truncf %40 : vector<4x15x12xf32> to vector<4x15x12xbf16>
    %c0_20 = arith.constant 0 : index
    %c0_21 = arith.constant 0 : index
    %42 = vector.load %arg4[%c0_20, %c0_21] : memref<8x15xbf16, #tpu.memory_space<vmem>>, vector<8x15xbf16>
    %43 = vector.extract_strided_slice %41 {offsets = [0, 0, 0], sizes = [1, 15, 12], strides = [1, 1, 1]} : vector<4x15x12xbf16> to vector<1x15x12xbf16>
    %44 = vector.shape_cast %43 : vector<1x15x12xbf16> to vector<15x12xbf16>
    %cst_22 = arith.constant dense<0.000000e+00> : vector<8x12xf32>
    %45 = tpu.matmul %42, %44, %cst_22 {dimension_numbers = #tpu.dot_dimension_numbers<[1], [0], [0], [1], [0, 0, 1, 1], [], []>} : vector<8x15xbf16>, vector<15x12xbf16>, vector<8x12xf32> -> vector<8x12xf32>
    %46 = vector.extract_strided_slice %45 {offsets = [0, 0], sizes = [8, 11], strides = [1, 1]} : vector<8x12xf32> to vector<8x11xf32>
    %47 = vector.extract_strided_slice %45 {offsets = [0, 1], sizes = [8, 11], strides = [1, 1]} : vector<8x12xf32> to vector<8x11xf32>
    %48 = arith.maximumf %46, %47 : vector<8x11xf32>
    %49 = arith.truncf %48 : vector<8x11xf32> to vector<8x11xbf16>
    %c0_23 = arith.constant 0 : index
    %c0_24 = arith.constant 0 : index
    %50 = vector.load %arg5[%c0_23, %c0_24] : memref<11x6xbf16, #tpu.memory_space<vmem>>, vector<11x6xbf16>
    %cst_25 = arith.constant dense<0.000000e+00> : vector<8x6xf32>
    %51 = tpu.matmul %49, %50, %cst_25 {dimension_numbers = #tpu.dot_dimension_numbers<[1], [0], [0], [1], [0, 0, 1, 1], [], []>} : vector<8x11xbf16>, vector<11x6xbf16>, vector<8x6xf32> -> vector<8x6xf32>
    %52 = arith.truncf %51 : vector<8x6xf32> to vector<8x6xbf16>
    %c0_26 = arith.constant 0 : index
    %c0_27 = arith.constant 0 : index
    %c0_28 = arith.constant 0 : index
    %53 = vector.load %arg6[%c0_26, %c0_27, %c0_28] : memref<4x8x6xbf16, #tpu.memory_space<vmem>>, vector<1x8x6xbf16>
    %54 = vector.shape_cast %53 : vector<1x8x6xbf16> to vector<8x6xbf16>
    %55 = vector.shape_cast %52 : vector<8x6xbf16> to vector<1x8x6xbf16>
    tpu.vector_store %arg6[%c0_26, %c0_27, %c0_28], %55 {strides = array<i32>} : memref<4x8x6xbf16, #tpu.memory_space<vmem>>, vector<1x8x6xbf16>,
    %c0_29 = arith.constant 0 : index
    %c0_30 = arith.constant 0 : index
    %56 = vector.load %arg4[%c0_29, %c0_30] : memref<8x15xbf16, #tpu.memory_space<vmem>>, vector<8x15xbf16>
    %57 = vector.extract_strided_slice %41 {offsets = [1, 0, 0], sizes = [1, 15, 12], strides = [1, 1, 1]} : vector<4x15x12xbf16> to vector<1x15x12xbf16>
    %58 = vector.shape_cast %57 : vector<1x15x12xbf16> to vector<15x12xbf16>
    %cst_31 = arith.constant dense<0.000000e+00> : vector<8x12xf32>
    %59 = tpu.matmul %56, %58, %cst_31 {dimension_numbers = #tpu.dot_dimension_numbers<[1], [0], [0], [1], [0, 0, 1, 1], [], []>} : vector<8x15xbf16>, vector<15x12xbf16>, vector<8x12xf32> -> vector<8x12xf32>
    %60 = vector.extract_strided_slice %59 {offsets = [0, 0], sizes = [8, 11], strides = [1, 1]} : vector<8x12xf32> to vector<8x11xf32>
    %61 = vector.extract_strided_slice %59 {offsets = [0, 1], sizes = [8, 11], strides = [1, 1]} : vector<8x12xf32> to vector<8x11xf32>
    %62 = arith.maximumf %60, %61 : vector<8x11xf32>
    %63 = arith.truncf %62 : vector<8x11xf32> to vector<8x11xbf16>
    %c0_32 = arith.constant 0 : index
    %c0_33 = arith.constant 0 : index
    %64 = vector.load %arg5[%c0_32, %c0_33] : memref<11x6xbf16, #tpu.memory_space<vmem>>, vector<11x6xbf16>
    %cst_34 = arith.constant dense<0.000000e+00> : vector<8x6xf32>
    %65 = tpu.matmul %63, %64, %cst_34 {dimension_numbers = #tpu.dot_dimension_numbers<[1], [0], [0], [1], [0, 0, 1, 1], [], []>} : vector<8x11xbf16>, vector<11x6xbf16>, vector<8x6xf32> -> vector<8x6xf32>
    %66 = arith.truncf %65 : vector<8x6xf32> to vector<8x6xbf16>
    %c1_35 = arith.constant 1 : index
    %c0_36 = arith.constant 0 : index
    %c0_37 = arith.constant 0 : index
    %67 = vector.load %arg6[%c1_35, %c0_36, %c0_37] : memref<4x8x6xbf16, #tpu.memory_space<vmem>>, vector<1x8x6xbf16>
    %68 = vector.shape_cast %67 : vector<1x8x6xbf16> to vector<8x6xbf16>
    %69 = vector.shape_cast %66 : vector<8x6xbf16> to vector<1x8x6xbf16>
    tpu.vector_store %arg6[%c1_35, %c0_36, %c0_37], %69 {strides = array<i32>} : memref<4x8x6xbf16, #tpu.memory_space<vmem>>, vector<1x8x6xbf16>,
    %c0_38 = arith.constant 0 : index
    %c0_39 = arith.constant 0 : index
    %70 = vector.load %arg4[%c0_38, %c0_39] : memref<8x15xbf16, #tpu.memory_space<vmem>>, vector<8x15xbf16>
    %71 = vector.extract_strided_slice %41 {offsets = [2, 0, 0], sizes = [1, 15, 12], strides = [1, 1, 1]} : vector<4x15x12xbf16> to vector<1x15x12xbf16>
    %72 = vector.shape_cast %71 : vector<1x15x12xbf16> to vector<15x12xbf16>
    %cst_40 = arith.constant dense<0.000000e+00> : vector<8x12xf32>
    %73 = tpu.matmul %70, %72, %cst_40 {dimension_numbers = #tpu.dot_dimension_numbers<[1], [0], [0], [1], [0, 0, 1, 1], [], []>} : vector<8x15xbf16>, vector<15x12xbf16>, vector<8x12xf32> -> vector<8x12xf32>
    %74 = vector.extract_strided_slice %73 {offsets = [0, 0], sizes = [8, 11], strides = [1, 1]} : vector<8x12xf32> to vector<8x11xf32>
    %75 = vector.extract_strided_slice %73 {offsets = [0, 1], sizes = [8, 11], strides = [1, 1]} : vector<8x12xf32> to vector<8x11xf32>
    %76 = arith.maximumf %74, %75 : vector<8x11xf32>
    %77 = arith.truncf %76 : vector<8x11xf32> to vector<8x11xbf16>
    %c0_41 = arith.constant 0 : index
    %c0_42 = arith.constant 0 : index
    %78 = vector.load %arg5[%c0_41, %c0_42] : memref<11x6xbf16, #tpu.memory_space<vmem>>, vector<11x6xbf16>
    %cst_43 = arith.constant dense<0.000000e+00> : vector<8x6xf32>
    %79 = tpu.matmul %77, %78, %cst_43 {dimension_numbers = #tpu.dot_dimension_numbers<[1], [0], [0], [1], [0, 0, 1, 1], [], []>} : vector<8x11xbf16>, vector<11x6xbf16>, vector<8x6xf32> -> vector<8x6xf32>
    %80 = arith.truncf %79 : vector<8x6xf32> to vector<8x6xbf16>
    %c2_44 = arith.constant 2 : index
    %c0_45 = arith.constant 0 : index
    %c0_46 = arith.constant 0 : index
    %81 = vector.load %arg6[%c2_44, %c0_45, %c0_46] : memref<4x8x6xbf16, #tpu.memory_space<vmem>>, vector<1x8x6xbf16>
    %82 = vector.shape_cast %81 : vector<1x8x6xbf16> to vector<8x6xbf16>
    %83 = vector.shape_cast %80 : vector<8x6xbf16> to vector<1x8x6xbf16>
    tpu.vector_store %arg6[%c2_44, %c0_45, %c0_46], %83 {strides = array<i32>} : memref<4x8x6xbf16, #tpu.memory_space<vmem>>, vector<1x8x6xbf16>,
    %c0_47 = arith.constant 0 : index
    %c0_48 = arith.constant 0 : index
    %84 = vector.load %arg4[%c0_47, %c0_48] : memref<8x15xbf16, #tpu.memory_space<vmem>>, vector<8x15xbf16>
    %85 = vector.extract_strided_slice %41 {offsets = [3, 0, 0], sizes = [1, 15, 12], strides = [1, 1, 1]} : vector<4x15x12xbf16> to vector<1x15x12xbf16>
    %86 = vector.shape_cast %85 : vector<1x15x12xbf16> to vector<15x12xbf16>
    %cst_49 = arith.constant dense<0.000000e+00> : vector<8x12xf32>
    %87 = tpu.matmul %84, %86, %cst_49 {dimension_numbers = #tpu.dot_dimension_numbers<[1], [0], [0], [1], [0, 0, 1, 1], [], []>} : vector<8x15xbf16>, vector<15x12xbf16>, vector<8x12xf32> -> vector<8x12xf32>
    %88 = vector.extract_strided_slice %87 {offsets = [0, 0], sizes = [8, 11], strides = [1, 1]} : vector<8x12xf32> to vector<8x11xf32>
    %89 = vector.extract_strided_slice %87 {offsets = [0, 1], sizes = [8, 11], strides = [1, 1]} : vector<8x12xf32> to vector<8x11xf32>
    %90 = arith.maximumf %88, %89 : vector<8x11xf32>
    %91 = arith.truncf %90 : vector<8x11xf32> to vector<8x11xbf16>
    %c0_50 = arith.constant 0 : index
    %c0_51 = arith.constant 0 : index
    %92 = vector.load %arg5[%c0_50, %c0_51] : memref<11x6xbf16, #tpu.memory_space<vmem>>, vector<11x6xbf16>
    %cst_52 = arith.constant dense<0.000000e+00> : vector<8x6xf32>
    %93 = tpu.matmul %91, %92, %cst_52 {dimension_numbers = #tpu.dot_dimension_numbers<[1], [0], [0], [1], [0, 0, 1, 1], [], []>} : vector<8x11xbf16>, vector<11x6xbf16>, vector<8x6xf32> -> vector<8x6xf32>
    %94 = arith.truncf %93 : vector<8x6xf32> to vector<8x6xbf16>
    %c3_53 = arith.constant 3 : index
    %c0_54 = arith.constant 0 : index
    %c0_55 = arith.constant 0 : index
    %95 = vector.load %arg6[%c3_53, %c0_54, %c0_55] : memref<4x8x6xbf16, #tpu.memory_space<vmem>>, vector<1x8x6xbf16>
    %96 = vector.shape_cast %95 : vector<1x8x6xbf16> to vector<8x6xbf16>
    %97 = vector.shape_cast %94 : vector<8x6xbf16> to vector<1x8x6xbf16>
    tpu.vector_store %arg6[%c3_53, %c0_54, %c0_55], %97 {strides = array<i32>} : memref<4x8x6xbf16, #tpu.memory_space<vmem>>, vector<1x8x6xbf16>,
    return
  }
  func.func @transform_0(%arg0: i32) -> (i32, i32, i32) {
    %c0_i32 = arith.constant 0 : i32
    %c0_i32_0 = arith.constant 0 : i32
    %c0_i32_1 = arith.constant 0 : i32
    return %arg0, %c0_i32, %c0_i32_0 : i32, i32, i32
  }
  func.func @transform_1(%arg0: i32) -> (i32, i32, i32) {
    %c0_i32 = arith.constant 0 : i32
    %c0_i32_0 = arith.constant 0 : i32
    %c0_i32_1 = arith.constant 0 : i32
    %c0_i32_2 = arith.constant 0 : i32
    return %c0_i32, %c0_i32_0, %c0_i32_1 : i32, i32, i32
  }
  func.func @transform_2(%arg0: i32) -> i32 {
    %c0_i32 = arith.constant 0 : i32
    %c0_i32_0 = arith.constant 0 : i32
    return %c0_i32 : i32
  }
  func.func @transform_3(%arg0: i32) -> (i32, i32) {
    %c0_i32 = arith.constant 0 : i32
    %c0_i32_0 = arith.constant 0 : i32
    %c0_i32_1 = arith.constant 0 : i32
    return %c0_i32, %c0_i32_0 : i32, i32
  }
  func.func @transform_4(%arg0: i32) -> (i32, i32) {
    %c0_i32 = arith.constant 0 : i32
    %c0_i32_0 = arith.constant 0 : i32
    %c0_i32_1 = arith.constant 0 : i32
    return %c0_i32, %c0_i32_0 : i32, i32
  }
  func.func @transform_5(%arg0: i32) -> (i32, i32, i32) {
    %c0_i32 = arith.constant 0 : i32
    %c0_i32_0 = arith.constant 0 : i32
    %c0_i32_1 = arith.constant 0 : i32
    return %arg0, %c0_i32, %c0_i32_0 : i32, i32, i32
  }
}

module attributes {stable_mosaic.version = 11 : i64} {
  func.func @mlp_kernel(%arg0: i32, %arg1: i32, %arg2: memref<8x128xbf16, #tpu.memory_space<vmem>>, %arg3: memref<128x256xbf16, #tpu.memory_space<vmem>>, %arg4: memref<1x256xf32, #tpu.memory_space<vmem>>, %arg5: memref<256x90xf32, #tpu.memory_space<vmem>>, %arg6: memref<1x8x90xf32, #tpu.memory_space<vmem>>, %arg7: memref<8x256xf32, #tpu.memory_space<vmem>>) attributes {dimension_semantics = [#tpu.dimension_semantics<parallel>, #tpu.dimension_semantics<arbitrary>], iteration_bounds = array<i64: 2, 1>, scalar_prefetch = 0 : i64, scratch_operands = 1 : i64, tpu.core_type = #tpu.core_type<tc>, window_params = [{transform_indices = @transform_0, window_bounds = array<i64: 8, 128>}, {transform_indices = @transform_1, window_bounds = array<i64: 128, 256>}, {transform_indices = @transform_2, window_bounds = array<i64: 1, 256>}, {transform_indices = @transform_3, window_bounds = array<i64: 256, 90>}, {transform_indices = @transform_4, window_bounds = array<i64: 1, 8, 90>}]} {
    %c0_i32 = arith.constant 0 : i32
    %0 = arith.cmpi eq, %arg1, %c0_i32 : i32
    %1 = arith.extui %0 : i1 to i32
    %c0_i32_0 = arith.constant 0 : i32
    %2 = arith.cmpi ne, %1, %c0_i32_0 : i32
    scf.if %2 {
      %cst_10 = arith.constant 0.000000e+00 : f32
      %12 = vector.broadcast %cst_10 : f32 to vector<8x256xf32>
      %c0_11 = arith.constant 0 : index
      %c0_12 = arith.constant 0 : index
      %13 = vector.load %arg7[%c0_11, %c0_12] : memref<8x256xf32, #tpu.memory_space<vmem>>, vector<8x256xf32>
      tpu.vector_store %arg7[%c0_11, %c0_12], %12 {strides = array<i32>} : memref<8x256xf32, #tpu.memory_space<vmem>>, vector<8x256xf32>,
    } else {
    }
    %c0 = arith.constant 0 : index
    %c0_1 = arith.constant 0 : index
    %3 = vector.load %arg7[%c0, %c0_1] : memref<8x256xf32, #tpu.memory_space<vmem>>, vector<8x256xf32>
    %c0_2 = arith.constant 0 : index
    %c0_3 = arith.constant 0 : index
    %4 = vector.load %arg2[%c0_2, %c0_3] : memref<8x128xbf16, #tpu.memory_space<vmem>>, vector<8x128xbf16>
    %c0_4 = arith.constant 0 : index
    %c0_5 = arith.constant 0 : index
    %5 = vector.load %arg3[%c0_4, %c0_5] : memref<128x256xbf16, #tpu.memory_space<vmem>>, vector<128x256xbf16>
    %cst = arith.constant dense<0.000000e+00> : vector<8x256xf32>
    %6 = tpu.matmul %4, %5, %cst {dimension_numbers = #tpu.dot_dimension_numbers<[1], [0], [0], [1], [0, 0, 1, 1], [], []>} : vector<8x128xbf16>, vector<128x256xbf16>, vector<8x256xf32> -> vector<8x256xf32>
    %7 = arith.addf %3, %6 : vector<8x256xf32>
    %c0_6 = arith.constant 0 : index
    %c0_7 = arith.constant 0 : index
    %8 = vector.load %arg7[%c0_6, %c0_7] : memref<8x256xf32, #tpu.memory_space<vmem>>, vector<8x256xf32>
    tpu.vector_store %arg7[%c0_6, %c0_7], %7 {strides = array<i32>} : memref<8x256xf32, #tpu.memory_space<vmem>>, vector<8x256xf32>,
    %c0_i32_8 = arith.constant 0 : i32
    %9 = arith.cmpi eq, %arg1, %c0_i32_8 : i32
    %10 = arith.extui %9 : i1 to i32
    %c0_i32_9 = arith.constant 0 : i32
    %11 = arith.cmpi ne, %10, %c0_i32_9 : i32
    scf.if %11 {
      %c0_10 = arith.constant 0 : index
      %c0_11 = arith.constant 0 : index
      %12 = vector.load %arg7[%c0_10, %c0_11] : memref<8x256xf32, #tpu.memory_space<vmem>>, vector<8x256xf32>
      %c0_12 = arith.constant 0 : index
      %c0_13 = arith.constant 0 : index
      %13 = vector.load %arg4[%c0_12, %c0_13] : memref<1x256xf32, #tpu.memory_space<vmem>>, vector<1x256xf32>
      %14 = vector.broadcast %13 : vector<1x256xf32> to vector<8x256xf32>
      %15 = arith.addf %12, %14 : vector<8x256xf32>
      %c0_14 = arith.constant 0 : index
      %c0_15 = arith.constant 0 : index
      %16 = vector.load %arg5[%c0_14, %c0_15] : memref<256x90xf32, #tpu.memory_space<vmem>>, vector<256x90xf32>
      %cst_16 = arith.constant dense<0.000000e+00> : vector<8x90xf32>
      %17 = tpu.matmul %15, %16, %cst_16 {dimension_numbers = #tpu.dot_dimension_numbers<[1], [0], [0], [1], [0, 0, 1, 1], [], []>} : vector<8x256xf32>, vector<256x90xf32>, vector<8x90xf32> -> vector<8x90xf32>
      %c0_17 = arith.constant 0 : index
      %c0_18 = arith.constant 0 : index
      %c0_19 = arith.constant 0 : index
      %18 = vector.load %arg6[%c0_17, %c0_18, %c0_19] : memref<1x8x90xf32, #tpu.memory_space<vmem>>, vector<1x8x90xf32>
      %19 = vector.shape_cast %18 : vector<1x8x90xf32> to vector<8x90xf32>
      %20 = vector.shape_cast %17 : vector<8x90xf32> to vector<1x8x90xf32>
      tpu.vector_store %arg6[%c0_17, %c0_18, %c0_19], %20 {strides = array<i32>} : memref<1x8x90xf32, #tpu.memory_space<vmem>>, vector<1x8x90xf32>,
    } else {
    }
    return
  }
  func.func @transform_0(%arg0: i32, %arg1: i32) -> (i32, i32) {
    %c0_i32 = arith.constant 0 : i32
    %c0_i32_0 = arith.constant 0 : i32
    return %c0_i32, %arg1 : i32, i32
  }
  func.func @transform_1(%arg0: i32, %arg1: i32) -> (i32, i32) {
    %c0_i32 = arith.constant 0 : i32
    return %arg1, %arg0 : i32, i32
  }
  func.func @transform_2(%arg0: i32, %arg1: i32) -> (i32, i32) {
    %c0_i32 = arith.constant 0 : i32
    %c0_i32_0 = arith.constant 0 : i32
    return %c0_i32, %arg0 : i32, i32
  }
  func.func @transform_3(%arg0: i32, %arg1: i32) -> (i32, i32) {
    %c0_i32 = arith.constant 0 : i32
    %c0_i32_0 = arith.constant 0 : i32
    return %arg0, %c0_i32 : i32, i32
  }
  func.func @transform_4(%arg0: i32, %arg1: i32) -> (i32, i32, i32) {
    %c0_i32 = arith.constant 0 : i32
    %c0_i32_0 = arith.constant 0 : i32
    %c0_i32_1 = arith.constant 0 : i32
    return %arg0, %c0_i32, %c0_i32_0 : i32, i32, i32
  }
}

</mosaic_0001>

<bundles_post_ra>
// kernel: simple_cnn_forward.3
= control target key start
LH: loop header
LB: loop body
LE: loop exit
PB: predicated region body
PF: predicated region fallthrough
CT: control target
= control target key end

     0   :  { %s949_s15 = smov 0   ;;  %s951_s16 = smov 0   ;;  %s1096_s0 = inlined_call_operand.vmem [shape: bf16[8,128], index: 0, kind: input, shape index: {}]   ;;  %s1097_s1 = inlined_call_operand.vmem [shape: bf16[128,512], index: 1, kind: input, shape index: {}]   ;;  %s1098_s2 = inlined_call_operand.vmem [shape: f32[1,512], index: 2, kind: input, shape index: {}]   ;;  %s1099_s3 = inlined_call_operand.vmem [shape: f32[512,90], index: 3, kind: input, shape index: {}]   ;;  %s1100_s4 = inlined_call_operand.vmem [shape: f32[2,8,90], index: 4, kind: output, shape index: {}]  }
   0x1   :  { %s953_s17 = smov 0   ;;  %s955_s18 = smov 0  }
   0x2   :  { %s957_s19 = smov 0  }
   0x3 LB: > { %s26_s20 = sadd.s32 1, %s917_s18  ;;  %p68_p1 = scmp.ne.s32.totalorder %s909_s16, %s905_s15  ;;  %s921_s19 = sphi %s957_s19, %s14_s19   ;;  %s917_s18 = sphi %s955_s18, %s1104_s18   ;;  %s913_s17 = sphi %s953_s17, %s1103_s17   ;;  %s909_s16 = sphi %s951_s16, %s1102_s16   ;;  %s905_s15 = sphi %s949_s15, %s1101_s15  }
   0x4   : > { %p28_p0 = scmp.ge.s32.totalorder %s26_s20, 2  ;;  %p69_p2 = scmp.eq.s32.totalorder %s921_s19, 0 }
   0x5   : > { %s61_s22 = sadd.s32 1, %s909_s16  ;;  %p754_p5 = scmp.ge.s32.totalorder %s921_s19, 2 }
   0x6   : > { %s1106_s20 = smov (%p28_p0, %s26_s20), 0  ;;  %p70_p3 = por %p69_p2, %p68_p1 }
   0x7   : > { %s57_s21 = ssub.s32 %s917_s18, %s1106_s20  ;;  %179 = sbr.rel (%p754_p5) target bundleno = 24 (0x18), region = 20 }
   0x8   : > { %p59_p4 = scmp.eq.s32.totalorder %s57_s21, 0 }
   0xa   : > { %s984_s23 = scalar_select %p59_p4, %s909_s16, %s61_s22  }
   0xc   : > { %182 = sbr.rel (!%p70_p3) target bundleno = 24 (0x18), region = 24  ;;  %s184_s24 = sand.u32 (%p70_p3), 1, %s909_s16  }
   0xd   : > { %s782_s25 = sshll.u32 (%p70_p3), %s917_s18, 3  ;;  %s755_s26 = sshll.u32 (%p70_p3), %s184_s24, 7 }
   0xe   : > { %s992_s29 = scalar_lea.vmem (%p70_p3), %s1097_s1, %s782_s25  ;;  %s186_s30 = scalar_lea.vmem (%p70_p3), [#allocation3], %s755_s26 }
   0xf   : > { %v251_v0 = vld [vmem:[%s992_s29] sm:$0xff] (%p70_p3)  ;;  %v253_v1 = vld [vmem:[%s992_s29 + $0x10] sm:$0xff] (%p70_p3) }
  0x10   : > { %v255_v2 = vld [vmem:[%s992_s29 + $0x20] sm:$0xff] (%p70_p3)  ;;  %252 = vst [vmem:[%s186_s30] sm:$0xff] (%p70_p3), %v251_v0  ;;  %254 = vst [vmem:[%s186_s30 + $0x8] sm:$0xff] (%p70_p3), %v253_v1  ;;  %v257_v3 = vld [vmem:[%s992_s29 + $0x30] sm:$0xff] (%p70_p3) }
  0x11   : > { %256 = vst [vmem:[%s186_s30 + $0x10] sm:$0xff] %v255_v2  ;;  %v259_v4 = vld [vmem:[%s992_s29 + $0x40] sm:$0xff]  ;;  %v261_v5 = vld [vmem:[%s992_s29 + $0x50] sm:$0xff]  ;;  %258 = vst [vmem:[%s186_s30 + $0x18] sm:$0xff] %v257_v3 }
  0x12   : > { %260 = vst [vmem:[%s186_s30 + $0x20] sm:$0xff] %v259_v4  ;;  %262 = vst [vmem:[%s186_s30 + $0x28] sm:$0xff] %v261_v5  ;;  %v263_v6 = vld [vmem:[%s992_s29 + $0x60] sm:$0xff]  ;;  %v265_v7 = vld [vmem:[%s992_s29 + $0x70] sm:$0xff] }
  0x13   : > { %v267_v8 = vld [vmem:[%s992_s29 + $0x80] sm:$0xff]  ;;  %264 = vst [vmem:[%s186_s30 + $0x30] sm:$0xff] %v263_v6  ;;  %266 = vst [vmem:[%s186_s30 + $0x38] sm:$0xff] %v265_v7  ;;  %v269_v9 = vld [vmem:[%s992_s29 + $0x90] sm:$0xff] }
  0x14   : > { %268 = vst [vmem:[%s186_s30 + $0x40] sm:$0xff] %v267_v8  ;;  %v271_v10 = vld [vmem:[%s992_s29 + $0xa0] sm:$0xff]  ;;  %v273_v11 = vld [vmem:[%s992_s29 + $0xb0] sm:$0xff]  ;;  %270 = vst [vmem:[%s186_s30 + $0x48] sm:$0xff] %v269_v9 }
  0x15   : > { %272 = vst [vmem:[%s186_s30 + $0x50] sm:$0xff] %v271_v10  ;;  %274 = vst [vmem:[%s186_s30 + $0x58] sm:$0xff] %v273_v11  ;;  %v275_v12 = vld [vmem:[%s992_s29 + $0xc0] sm:$0xff]  ;;  %v277_v13 = vld [vmem:[%s992_s29 + $0xd0] sm:$0xff] }
  0x16   : > { %v279_v14 = vld [vmem:[%s992_s29 + $0xe0] sm:$0xff]  ;;  %276 = vst [vmem:[%s186_s30 + $0x60] sm:$0xff] %v275_v12  ;;  %278 = vst [vmem:[%s186_s30 + $0x68] sm:$0xff] %v277_v13  ;;  %v281_v15 = vld [vmem:[%s992_s29 + $0xf0] sm:$0xff] }
  0x17   : > { %280 = vst [vmem:[%s186_s30 + $0x70] sm:$0xff] %v279_v14  ;;  %282 = vst [vmem:[%s186_s30 + $0x78] sm:$0xff] %v281_v15 }
  0x18 PF: > { %p758_p6 = scmp.ge.s32.totalorder %s921_s19, 1  ;;  %p304_p7 = scmp.lt.s32.totalorder %s921_s19, 3 }
  0x1a   : > { %p305_p8 = pnand %p758_p6, %p304_p7 }
  0x1b   : > { %s311_s5 = sand.u32 (!%p305_p8), 1, %s905_s15   ;;  %s761_s6 = sshll.u32 (!%p305_p8), %s913_s17, 5 }
  0x1c   : > { %308 = sbr.rel (%p305_p8) target bundleno = 462 (0x1ce), region = 70  ;;  %s759_s7 = sshll.u32 (!%p305_p8), %s311_s5, 7 }
  0x1d   : > { %p360_p9 = scmp.lt.s32.totalorder (!%p305_p8), %s761_s6, 63  ;;  %s1014_s8 = scalar_lea.vmem (!%p305_p8), [#allocation3], %s759_s7 }
  0x1e   : > { %s760_s15 = sshll.u32 (!%p305_p8), %s913_s17, 1  ;;  %p365_p11 = scmp.lt.s32.totalorder (!%p305_p8), %s913_s17, 1 }
  0x1f   : > { %p355_p10 = scmp.lt.s32.totalorder (!%p305_p8), %s760_s15, 3 }
  0x21   : > { %v923_v16 = vmov 0   ;;  %v859_v17 = vld [vmem:[%s1014_s8 + $0x74] ss:$8 sps:$4 sm:$0xff]   ;;  %s1108_s6 = smov (!%p360_p9, %s761_s6), 63  ;;  %v861_v18 = vld [vmem:[%s1014_s8 + $0x70] ss:$8 sps:$4 sm:$0xff]   ;;  %v527_v2 = vlaneseq }
  0x22   : > { %507 = vmatprep.mubr.bf16.mxu0 %v923_v16  ;;  %475 = vmatprep.subr.bf16.mxu0 %v859_v17  ;;  %v862_v19 = vld [vmem:[%s1014_s8 + $0x64] ss:$8 sps:$4 sm:$0xff]   ;;  %v864_v20 = vld [vmem:[%s1014_s8 + $0x60] ss:$8 sps:$4 sm:$0xff]   ;;  %v865_v21 = vld [vmem:[%s1014_s8 + $0x54] ss:$8 sps:$4 sm:$0xff]  }
  0x23   : > { %476 = vmatpush1.bf16.msra.mxu0 %v861_v18  ;;  %s762_s9 = sshll.u32 %s1108_s6, 3  ;;  %v867_v22 = vld [vmem:[%s1014_s8 + $0x50] ss:$8 sps:$4 sm:$0xff]   ;;  %v868_v23 = vld [vmem:[%s1014_s8 + $0x44] ss:$8 sps:$4 sm:$0xff]   ;;  %s1110_s15 = smov (!%p355_p10, %s760_s15), 3 }
  0x24   : > { %477 = vmatprep.subr.bf16.mxu0 %v862_v19  ;;  %s1025_s12 = scalar_lea.vmem %s1099_s3, %s762_s9  ;;  %v870_v24 = vld [vmem:[%s1014_s8 + $0x40] ss:$8 sps:$4 sm:$0xff]   ;;  %v871_v29 = vld [vmem:[%s1014_s8 + $0x34] ss:$8 sps:$4 sm:$0xff]   ;;  %v873_v33 = vld [vmem:[%s1014_s8 + $0x30] ss:$8 sps:$4 sm:$0xff]   ;;  %s357_s24 = scalar_lea.vmem %s1098_s2, %s1110_s15 }
  0x25   : > { %v570_v25 = vld [vmem:[%s1025_s12 + $0xf8] sm:$0xff]  ;;  %v569_v27 = vld [vmem:[%s1025_s12 + $0xf0] sm:$0xff]  ;;  %v568_v30 = vld [vmem:[%s1025_s12 + $0xe8] sm:$0xff]  ;;  %v528_v3 = vshrl.u32 %v527_v2, 7  ;;  %s1112_s17 = smov (!%p365_p11, %s913_s17), 1  ;;  %vm641_vm0 = vcmask 736256  }
  0x26   : > { %783 = vmatprep.subr.mxu1 %v570_v25  ;;  %v554_v26 = vld [vmem:[%s1025_s12 + $0x78] sm:$0xff]  ;;  %v553_v28 = vld [vmem:[%s1025_s12 + $0x70] sm:$0xff]  ;;  %v552_v31 = vld [vmem:[%s1025_s12 + $0x68] sm:$0xff]  ;;  %s763_s25 = sshll.u32 %s1112_s17, 3 }
  0x27   : > { %478 = vmatpush1.bf16.msra.mxu0 %v864_v20  ;;  %784 = vmatpush3.msra.mxu1 %v554_v26  ;;  %v567_v32 = vld [vmem:[%s1025_s12 + $0xe0] sm:$0xff]  ;;  %v566_v36 = vld [vmem:[%s1025_s12 + $0xd8] sm:$0xff]  ;;  %v565_v38 = vld [vmem:[%s1025_s12 + $0xd0] sm:$0xff]  ;;  %v533_v4 = vsub.s32 1, %v528_v3  ;;  %v529_v5 = vsub.s32 0, %v528_v3  ;;  %s368_s28 = scalar_lea.vmem %s1100_s4, %s763_s25 }
  0x28   : > { %479 = vmatprep.subr.bf16.mxu0 %v865_v21  ;;  %785 = vmatprep.subr.mxu1 %v569_v27  ;;  %v551_v34 = vld [vmem:[%s1025_s12 + $0x60] sm:$0xff]  ;;  %v550_v37 = vld [vmem:[%s1025_s12 + $0x58] sm:$0xff]  ;;  %v549_v40 = vld [vmem:[%s1025_s12 + $0x50] sm:$0xff] }
  0x29   : > { %786 = vmatpush3.msra.mxu1 %v553_v28  ;;  %v874_v35 = vld [vmem:[%s1014_s8 + $0x24] ss:$8 sps:$4 sm:$0xff]   ;;  %v876_v39 = vld [vmem:[%s1014_s8 + $0x20] ss:$8 sps:$4 sm:$0xff]   ;;  %v877_v41 = vld [vmem:[%s1014_s8 + $0x14] ss:$8 sps:$4 sm:$0xff]  }
  0x2a   : > { %787 = vmatprep.subr.mxu1 %v568_v30  ;;  %v564_v42 = vld [vmem:[%s1025_s12 + $0xc8] sm:$0xff]  ;;  %v563_v44 = vld [vmem:[%s1025_s12 + $0xc0] sm:$0xff]  ;;  %v879_v45 = vld [vmem:[%s1014_s8 + $0x10] ss:$8 sps:$4 sm:$0xff]  }
  0x2b   : > { %480 = vmatpush1.bf16.msra.mxu0 %v867_v22  ;;  %788 = vmatpush3.msra.mxu1 %v552_v31  ;;  %v548_v43 = vld [vmem:[%s1025_s12 + $0x48] sm:$0xff]  ;;  %v547_v46 = vld [vmem:[%s1025_s12 + $0x40] sm:$0xff]  ;;  %v562_v48 = vld [vmem:[%s1025_s12 + $0xb8] sm:$0xff] }
  0x2c   : > { %481 = vmatprep.subr.bf16.mxu0 %v868_v23  ;;  %789 = vmatprep.subr.mxu1 %v567_v32  ;;  %v880_v47 = vld [vmem:[%s1014_s8 + $0x4] ss:$8 sps:$4 sm:$0xff]   ;;  %v546_v49 = vld [vmem:[%s1025_s12 + $0x38] sm:$0xff]  ;;  %v561_v50 = vld [vmem:[%s1025_s12 + $0xb0] sm:$0xff] }
  0x2d   : > { %790 = vmatpush3.msra.mxu1 %v551_v34  ;;  %v882_v51 = vld [vmem:[%s1014_s8] ss:$8 sps:$4 sm:$0xff]   ;;  %v545_v52 = vld [vmem:[%s1025_s12 + $0x30] sm:$0xff]  ;;  %v558_v58 = vld [vmem:[%s1025_s12 + $0x98] sm:$0xff] }
  0x2e   : > { %791 = vmatprep.subr.mxu1 %v566_v36  ;;  %v560_v53 = vld [vmem:[%s1025_s12 + $0xa8] sm:$0xff]  ;;  %v559_v55 = vld [vmem:[%s1025_s12 + $0xa0] sm:$0xff]  ;;  %v542_v59 = vld [vmem:[%s1025_s12 + $0x18] sm:$0xff] }
  0x2f   : > { %482 = vmatpush1.bf16.msra.mxu0 %v870_v24  ;;  %792 = vmatpush3.msra.mxu1 %v550_v37  ;;  %v544_v54 = vld [vmem:[%s1025_s12 + $0x28] sm:$0xff]  ;;  %v378_v56 = vld [vmem:[%s1096_s0] sm:$0xf]  ;;  %v557_v60 = vld [vmem:[%s1025_s12 + $0x90] sm:$0xff] }
  0x30   : > { %483 = vmatprep.subr.bf16.mxu0 %v871_v29  ;;  %793 = vmatprep.subr.mxu1 %v565_v38  ;;  %v543_v57 = vld [vmem:[%s1025_s12 + $0x20] sm:$0xff]  ;;  %v541_v61 = vld [vmem:[%s1025_s12 + $0x10] sm:$0xff]  ;;  %v556_v62 = vld [vmem:[%s1025_s12 + $0x88] sm:$0xff] }
  0x31   : > { %794 = vmatpush3.msra.mxu1 %v549_v40  ;;  %v540_v63 = vld [vmem:[%s1025_s12 + $0x8] sm:$0xff]  ;;  %v555_v0 = vld [vmem:[%s1025_s12 + $0x80] sm:$0xff] }
  0x32   : > { %795 = vmatprep.subr.mxu1 %v564_v42  ;;  %v539_v1 = vld [vmem:[%s1025_s12] sm:$0xff] }
  0x33   : > { %484 = vmatpush1.bf16.msra.mxu0 %v873_v33  ;;  %796 = vmatpush3.msra.mxu1 %v548_v43  ;;  %v525_v6 = vld [vmem:[%s357_s24] sm:$0x3] }
  0x34   : > { %485 = vmatprep.subr.bf16.mxu0 %v874_v35  ;;  %797 = vmatprep.subr.mxu1 %v563_v44  ;;  %v534_v7 = vrot.slane %v525_v6, %v533_v4  ;;  %v530_v9 = vrot.slane %v525_v6, %v529_v5 }
  0x35   : > { %798 = vmatpush3.msra.mxu1 %v547_v46 }
  0x36   : > { %799 = vmatprep.subr.mxu1 %v562_v48 }
  0x37   : > { %486 = vmatpush1.bf16.msra.mxu0 %v876_v39  ;;  %800 = vmatpush3.msra.mxu1 %v546_v49 }
  0x38   : > { %487 = vmatprep.subr.bf16.mxu0 %v877_v41  ;;  %801 = vmatprep.subr.mxu1 %v561_v50 }
  0x39   : > { %802 = vmatpush3.msra.mxu1 %v545_v52 }
  0x3a   : > { %803 = vmatprep.subr.mxu1 %v560_v53 }
  0x3b   : > { %488 = vmatpush1.bf16.msra.mxu0 %v879_v45  ;;  %804 = vmatpush3.msra.mxu1 %v544_v54 }
  0x3c   : > { %489 = vmatprep.subr.bf16.mxu0 %v880_v47  ;;  %805 = vmatprep.subr.mxu1 %v559_v55 }
  0x3d   : > { %806 = vmatpush3.msra.mxu1 %v543_v57 }
  0x3e   : > { %807 = vmatprep.subr.mxu1 %v558_v58 }
  0x3f   : > { %490 = vmatpush1.bf16.msra.mxu0 %v882_v51  ;;  %808 = vmatpush3.msra.mxu1 %v542_v59 }
  0x40   : > { %809 = vmatprep.subr.mxu1 %v557_v60 }
  0x41   : > { %810 = vmatpush3.msra.mxu1 %v541_v61 }
  0x42   : > { %508 = vmatmul.mubr.bf16.vlgmr.msra.gmra.mxu0 %v378_v56  ;;  %811 = vmatprep.subr.mxu1 %v556_v62 }
  0x43   : > { %812 = vmatpush3.msra.mxu1 %v540_v63 }
  0x44   : > { %813 = vmatprep.subr.mxu1 %v555_v0 }
  0x45   : > { %814 = vmatpush3.msra.mxu1 %v539_v1 }
 0x102   : > { %v509_v8 = vpop.f32.mrf.mxu0 }
 0x103   : > { %v537_v12 = vadd.f32 %v530_v9, %v509_v8 }
 0x104   : > { %v511_v10 = vpop.f32.mrf.mxu0 }
 0x105   : > { %v538_v11 = vadd.f32 %v534_v7, %v511_v10 }
 0x106   : > { %v513_v13 = vpop.f32.mrf.mxu0 }
 0x107   : > { %635 = vmatprep.mubr.f32.mxu1 %v538_v11 }
 0x108   : > { %v514_v14 = vpop.f32.mrf.mxu0  ;;  %636 = vmatmul.mubr.f32.vlgmr.msra.gmra.mxu1 %v537_v12 }
 0x1c8   : > { %v815_v15 = vpop.f32.mrf.mxu1 }
 0x1ca   : > { %v816_v16 = vpop.f32.mrf.mxu1 }
 0x1cb   : > { %v817_v17 = vadd.f32 %v816_v16, %v815_v15 }
 0x1cd   : > { %642 = vst.msk [vmem:[%s368_s28] sm:$0xff] %vm641_vm0, %v817_v17 }
 0x1ce PF: > { %s14_s19 = sadd.s32 1, %s921_s19   ;;  %s1101_s15 = smov %s909_s16 }
 0x1cf   : > { %p11_p12 = scmp.ge.s32.totalorder %s14_s19, 4   ;;  %s1102_s16 = smov %s984_s23 }
 0x1d0   : > { %s1103_s17 = smov %s917_s18  ;;  %s1104_s18 = smov %s1106_s20 }
 0x1d1   :  { %13 = sbr.rel (!%p11_p12) target bundleno = 3 (0x3), region = 126 }

// kernel: simple_cnn_forward.2
= control target key start
LH: loop header
LB: loop body
LE: loop exit
PB: predicated region body
PF: predicated region fallthrough
CT: control target
= control target key end

     0   :  { %s1852_s20 = smov 0   ;;  %s2251_s0 = inlined_call_operand.vmem [shape: bf16[8,20,16], index: 0, kind: input, shape index: {}]   ;;  %s2252_s1 = inlined_call_operand.vmem [shape: bf16[5,16,12], index: 1, kind: input, shape index: {}]   ;;  %s2253_s2 = inlined_call_operand.<no memory space> [shape: f32[1], index: 2, kind: input, shape index: {}]   ;;  %s2254_s3 = inlined_call_operand.vmem [shape: bf16[8,15], index: 3, kind: input, shape index: {}]   ;;  %s2255_s4 = inlined_call_operand.vmem [shape: bf16[11,6], index: 4, kind: input, shape index: {}]   ;;  %s2256_s5 = inlined_call_operand.vmem [shape: bf16[8,8,6], index: 5, kind: output, shape index: {}]  }
   0x1   :  { %10 = sst [smem:[#allocation2]] %s2253_s2 }
   0x2 LB: > { %s1555_s21 = sadd.s32 4294967295, %s1813_s20   ;;  %p1559_p0 = scmp.ge.s32.totalorder %s1813_s20, 1  ;;  %s1813_s20 = sphi %s1852_s20, %s16_s20  }
   0x3   : > { %p190_p1 = scmp.lt.s32.totalorder %s1813_s20, 3 }
   0x5   : > { %p191_p2 = pnand %p1559_p0, %p190_p1 }
   0x6   : > { %s1560_s2 = sshll.u32 (!%p191_p2), %s1555_s21, 2  ;;  %s995_s11 = sld [smem:[#allocation2]] (!%p191_p2) }
   0x7   : > { %194 = sbr.rel (%p191_p2) target bundleno = 821 (0x335), region = 40  ;;  %p220_p3 = scmp.lt.s32.totalorder (!%p191_p2), %s1560_s2, 7 }
   0x8   : > { %s1818_s23 = smov (!%p191_p2), 127  }
   0xc   : > { %v1794_v0 = vld [vmem:[%s2252_s1 + $0x8] sm:$0xff]   ;;  %v1795_v1 = vld [vmem:[%s2252_s1] sm:$0xff]   ;;  %v1869_v2 = vld [vmem:[%s2252_s1 + $0x10] sm:$0xff]   ;;  %s2266_s2 = smov (!%p220_p3, %s1560_s2), 7  ;;  %vm247_vm0 = vsmask.f32 3328 }
   0xd   : > { %1683 = vmatprep.subr.bf16.mxu0 %v1794_v0  ;;  %1693 = vmatprep.subr.bf16.mxu1 %v1795_v1  ;;  %v1877_v3 = vld [vmem:[%s2252_s1 + $0x18] sm:$0xff]   ;;  %s1781_s30 = smul.u32 12, %s2266_s2  ;;  %vm367_vm1 = vcmask 130048   ;;  %vm248_vm2 = vsmask.f32 7440  ;;  %vm552_vm4 = vcmask 1042432  }
   0xe   : > { %1684 = vmatpush3.bf16.msra.mxu0 %v1794_v0  ;;  %1694 = vmatpush3.bf16.msra.mxu1 %v1795_v1  ;;  %vm1925_vm3 = vmor %vm247_vm0, %vm248_vm2  ;;  %vm553_vm5 = vcmask 1046532   ;;  %vm689_vm6 = vsmask.f32 2304  ;;  %vm690_vm7 = vsmask.f32 6416  ;;  %vm858_vm10 = vcmask 1041408  }
   0xf   : > { %1703 = vmatprep.subr.bf16.mxu0 %v1869_v2  ;;  %1713 = vmatprep.subr.bf16.mxu1 %v1877_v3  ;;  %s1884_s8 = scalar_lea.vmem %s2251_s0, %s1781_s30  ;;  %vm2021_vm8 = vmor %vm552_vm4, %vm553_vm5  ;;  %vm859_vm11 = vcmask 1045508   ;;  %vm1816_vm13 = vmmov 0   ;;  %vm1021_vm14 = vcmask 1046528   ;;  %vm1059_vm15 = vcmask 1047552   ;;  %s1563_s30 = sshll.u32 %s2266_s2, 2 }
  0x10   : > { %v1887_v4 = vld [vmem:[%s1884_s8] sm:$0xf]  ;;  %v1890_v5 = vld [vmem:[%s1884_s8 + $0x4] sm:$0xf]  ;;  %v1893_v6 = vld [vmem:[%s1884_s8 + $0x8] sm:$0x3] }
  0x11   : > { %v251_v7 = vshrl.u32 %v1887_v4, 16  ;;  %v254_v8 = vshll.u32 %v1887_v4, 16  ;;  %v260_v9 = vshll.u32 %v1890_v5, 16  ;;  %v264_v10 = vshrl.u32 %v1890_v5, 16  ;;  %v1900_v11 = vld [vmem:[%s1884_s8 + $0xc] sm:$0xf]  ;;  %vm2047_vm9 = vmor %vm689_vm6, %vm690_vm7 }
  0x12   : > { %v270_v12 = vshll.u32 %v1893_v6, 16  ;;  %v1575_v13 = vcombine.low %v1887_v4, %v1890_v5  ;;  %v275_v14 = vshrl.u32 %v1900_v11, 16  ;;  %v1907_v19 = vld [vmem:[%s1884_s8 + $0x10] sm:$0xf]  ;;  %v1917_v24 = vld [vmem:[%s1884_s8 + $0x14] sm:$0x3]  ;;  %vm2124_vm12 = vmor %vm858_vm10, %vm859_vm11 }
  0x13   : > { %v253_v15 = vrot.slane %v251_v7, 4  ;;  %v256_v16 = vrot.slane %v254_v8, 5  ;;  %v262_v17 = vrot.slane %v260_v9, 5  ;;  %v266_v18 = vrot.slane %v264_v10, 4  ;;  %v1934_v38 = vld [vmem:[%s1884_s8 + $0x18] sm:$0xf] }
  0x14   : > { %v272_v20 = vrot.slane %v270_v12, 5  ;;  %v1909_v21 = vrot.slane %v251_v7, 5  ;;  %v1911_v22 = vrot.slane %v254_v8, 6  ;;  %v1913_v23 = vrot.slane %v264_v10, 5  ;;  %1695 = vmatprep.mubr.msk.bf16.mxu1 %vm367_vm1, %v1575_v13  ;;  %v1937_v43 = vld [vmem:[%s1884_s8 + $0x1c] sm:$0xf] }
  0x15   : > { %v257_v25 = vor.u32 %v256_v16, %v253_v15  ;;  %v267_v26 = vor.u32 %v266_v18, %v262_v17  ;;  %v1919_v27 = vrot.slane %v260_v9, 6  ;;  %v1921_v28 = vrot.slane %v270_v12, 6  ;;  %v1958_v62 = vld [vmem:[%s1884_s8 + $0x20] sm:$0x3]  ;;  %v1970_v10 = vld [vmem:[%s1884_s8 + $0x24] sm:$0xf] }
  0x16   : > { %v277_v30 = vrot.slane %v275_v14, 4  ;;  %v278_v31 = vshll.u32 %v1900_v11, 16  ;;  %v284_v32 = vshll.u32 %v1907_v19, 16  ;;  %v288_v33 = vshrl.u32 %v1907_v19, 16  ;;  %v1973_v12 = vld [vmem:[%s1884_s8 + $0x28] sm:$0xf] }
  0x17   : > { %v258_v34 = vrot.slane %v257_v25, 4  ;;  %v268_v35 = vrot.slane %v267_v26, 4  ;;  %v294_v36 = vshll.u32 %v1917_v24, 16  ;;  %v707_v37 = vrot.slane %v275_v14, 5  ;;  %v1987_v18 = vld [vmem:[%s2252_s1 + $0x20] sm:$0xff]  }
  0x18   : > { %v280_v39 = vrot.slane %v278_v31, 5  ;;  %v286_v40 = vrot.slane %v284_v32, 5  ;;  %v290_v41 = vrot.slane %v288_v33, 4  ;;  %v708_v42 = vrot.slane %v278_v31, 6 }
  0x19   : > { %v263_v44 = vsel %vm1925_vm3, %v258_v34, %v262_v17  ;;  %v273_v45 = vsel %vm1925_vm3, %v268_v35, %v272_v20  ;;  %v296_v46 = vrot.slane %v294_v36, 5  ;;  %v711_v47 = vrot.slane %v288_v33, 5  ;;  %v1982_v17 = vld [vmem:[%s1884_s8 + $0x2c] sm:$0x3]  ;;  %s230_s8 = scalar_lea.vmem %s2256_s5, %s1563_s30 }
  0x1a   : > { %v1566_v48 = vcombine.low %v263_v44, %v273_v45  ;;  %v281_v49 = vor.u32 %v280_v39, %v277_v30  ;;  %v291_v50 = vor.u32 %v290_v41, %v286_v40  ;;  %v709_v51 = vor.u32 %v708_v42, %v707_v37 }
  0x1b   : > { %v712_v52 = vrot.slane %v284_v32, 6  ;;  %v716_v53 = vshrl.u32 %v1917_v24, 16  ;;  %v1944_v54 = vrot.slane %v294_v36, 6  ;;  %v1576_v55 = vcombine.low %v1900_v11, %v1907_v19 }
  0x1c   : > { %1685 = vmatprep.mubr.msk.bf16.mxu0 %vm367_vm1, %v1566_v48  ;;  %v282_v56 = vrot.slane %v281_v49, 4  ;;  %v292_v57 = vrot.slane %v291_v50, 4  ;;  %v1949_v58 = vrot.slane %v709_v51, 4  ;;  %v299_v59 = vshrl.u32 %v1934_v38, 16 }
  0x1d   : > { %v1952_v60 = vor.u32 %v712_v52, %v711_v47  ;;  %v1954_v61 = vrot.slane %v716_v53, 5  ;;  %1696 = vmatmul.mubr.msk.bf16.vlgmr.msra.gmra.mxu1 %vm367_vm1, %v1576_v55  ;;  %v302_v63 = vshll.u32 %v1934_v38, 16  ;;  %v308_v0 = vshll.u32 %v1937_v43, 16 }
  0x1e   : > { %v287_v1 = vsel %vm1925_vm3, %v282_v56, %v286_v40  ;;  %v297_v7 = vsel %vm1925_vm3, %v292_v57, %v296_v46  ;;  %v301_v8 = vrot.slane %v299_v59, 4  ;;  %v312_v9 = vshrl.u32 %v1937_v43, 16  ;;  %1714 = vmatpush3.bf16.msra.mxu1 %v1877_v3 }
  0x1f   : > { %v1567_v13 = vcombine.low %v287_v1, %v297_v7  ;;  %v715_v14 = vrot.slane %v1952_v60, 4  ;;  %v720_v15 = vor.u32 %v1944_v54, %v1954_v61  ;;  %v304_v16 = vrot.slane %v302_v63, 5 }
  0x20   : > { %v310_v3 = vrot.slane %v308_v0, 5  ;;  %v314_v20 = vrot.slane %v312_v9, 4  ;;  %v318_v25 = vshll.u32 %v1958_v62, 16  ;;  %v1577_v26 = vcombine.low %v1934_v38, %v1937_v43 }
  0x21   : > { %1686 = vmatmul.mubr.msk.bf16.vlgmr.msra.gmra.mxu0 %vm367_vm1, %v1567_v13  ;;  %v305_v30 = vor.u32 %v304_v16, %v301_v8  ;;  %v323_v31 = vshrl.u32 %v1970_v10, 16  ;;  %v326_v32 = vshll.u32 %v1970_v10, 16  ;;  %v332_v33 = vshll.u32 %v1973_v12, 16 }
  0x22   : > { %v315_v34 = vor.u32 %v314_v20, %v310_v3  ;;  %v320_v35 = vrot.slane %v318_v25, 5  ;;  %1699 = vmatprep.mubr.msk.bf16.mxu1 %vm367_vm1, %v1577_v26  ;;  %v336_v36 = vshrl.u32 %v1973_v12, 16  ;;  %v342_v37 = vshll.u32 %v1982_v17, 16  ;;  %1704 = vmatpush3.bf16.msra.mxu0 %v1869_v2 }
  0x23   : > { %v306_v39 = vrot.slane %v305_v30, 4  ;;  %v325_v40 = vrot.slane %v323_v31, 4  ;;  %v328_v41 = vrot.slane %v326_v32, 5  ;;  %v334_v42 = vrot.slane %v332_v33, 5  ;;  %1723 = vmatprep.subr.bf16.mxu0 %v1987_v18 }
  0x24   : > { %v316_v44 = vrot.slane %v315_v34, 4  ;;  %v338_v45 = vrot.slane %v336_v36, 4  ;;  %v344_v46 = vrot.slane %v342_v37, 5  ;;  %v1578_v2 = vcombine.low %v1970_v10, %v1973_v12 }
  0x25   : > { %v311_v48 = vsel %vm1925_vm3, %v306_v39, %v310_v3  ;;  %v329_v49 = vor.u32 %v328_v41, %v325_v40  ;;  %v1584_v50 = vrot.slane %v1887_v4, 9  ;;  %v557_v51 = vrot.slane %v1890_v5, 5 }
  0x26   : > { %v321_v52 = vsel %vm1925_vm3, %v316_v44, %v320_v35  ;;  %v339_v53 = vor.u32 %v338_v45, %v334_v42  ;;  %1700 = vmatmul.mubr.msk.bf16.gmra.mxu1 %vm367_vm1, %v1578_v2  ;;  %v560_v55 = vrot.slane %v1893_v6, 5  ;;  %v1585_v56 = vrot.slane %v1900_v11, 9 }
  0x27   : > { %v1568_v57 = vcombine.low %v311_v48, %v321_v52  ;;  %v330_v1 = vrot.slane %v329_v49, 4  ;;  %v558_v7 = vsel %vm2021_vm8, %v1584_v50, %v557_v51  ;;  %v559_v8 = vrot.slane %v557_v51, 4 }
  0x28   : > { %v340_v13 = vrot.slane %v339_v53, 4  ;;  %v564_v16 = vrot.slane %v1907_v19, 5  ;;  %v567_v3 = vrot.slane %v1917_v24, 5  ;;  %v694_v20 = vor.u32 %v1911_v22, %v1909_v21 }
  0x29   : > { %1689 = vmatprep.mubr.msk.bf16.mxu0 %vm367_vm1, %v1568_v57  ;;  %v335_v26 = vsel %vm1925_vm3, %v330_v1, %v334_v42  ;;  %v561_v30 = vsel %vm2021_vm8, %v559_v8, %v560_v55  ;;  %v698_v35 = vor.u32 %v1919_v27, %v1913_v23  ;;  %v701_v39 = vshrl.u32 %v1893_v6, 16 }
  0x2a   : > { %v345_v21 = vsel %vm1925_vm3, %v340_v13, %v344_v46  ;;  %v1590_v22 = vcombine.low %v558_v7, %v561_v30  ;;  %v565_v40 = vsel %vm2021_vm8, %v1585_v56, %v564_v16  ;;  %v566_v41 = vrot.slane %v564_v16, 4 }
  0x2b   : > { %v1569_v42 = vcombine.low %v335_v26, %v345_v21  ;;  %v695_v44 = vrot.slane %v694_v20, 4  ;;  %v700_v45 = vrot.slane %v698_v35, 4  ;;  %v703_v2 = vrot.slane %v701_v39, 5 }
  0x2c   : > { %v568_v48 = vsel %vm2021_vm8, %v566_v41, %v567_v3  ;;  %v714_v23 = vsel %vm2047_vm9, %v1949_v58, %v1952_v60  ;;  %v721_v27 = vsel %vm2047_vm9, %v715_v14, %v720_v15  ;;  %v1586_v29 = vrot.slane %v1934_v38, 9 }
  0x2d   : > { %1690 = vmatmul.mubr.msk.bf16.gmra.mxu0 %vm367_vm1, %v1569_v42  ;;  %v1591_v46 = vcombine.low %v565_v40, %v568_v48  ;;  %v699_v49 = vsel %vm2047_vm9, %v695_v44, %v698_v35  ;;  %v705_v50 = vor.u32 %v1921_v28, %v703_v2  ;;  %v1602_v54 = vcombine.low %v714_v23, %v721_v27 }
  0x2e   : > { %1705 = vmatprep.mubr.msk.bf16.mxu0 %vm367_vm1, %v1590_v22  ;;  %v571_v58 = vrot.slane %v1937_v43, 5  ;;  %v574_v60 = vrot.slane %v1958_v62, 5  ;;  %v578_v61 = vrot.slane %v1973_v12, 5  ;;  %v1587_v15 = vrot.slane %v1970_v10, 9 }
  0x2f   : > { %v706_v14 = vsel %vm2047_vm9, %v700_v45, %v705_v50  ;;  %v722_v51 = vrot.slane %v299_v59, 5  ;;  %v723_v28 = vrot.slane %v302_v63, 6  ;;  %v581_v56 = vrot.slane %v1982_v17, 5 }
  0x30   : > { %v1601_v52 = vcombine.low %v699_v49, %v706_v14  ;;  %v572_v53 = vsel %vm2021_vm8, %v1586_v29, %v571_v58  ;;  %v573_v55 = vrot.slane %v571_v58, 4  ;;  %v580_v57 = vrot.slane %v578_v61, 4 }
  0x31   : > { %v724_v1 = vor.u32 %v723_v28, %v722_v51  ;;  %v726_v7 = vrot.slane %v312_v9, 5  ;;  %v727_v8 = vrot.slane %v308_v0, 6  ;;  %v731_v63 = vshrl.u32 %v1958_v62, 16 }
  0x32   : > { %1715 = vmatprep.mubr.msk.bf16.mxu1 %vm367_vm1, %v1601_v52  ;;  %v575_v59 = vsel %vm2021_vm8, %v573_v55, %v574_v60  ;;  %v734_v13 = vrot.slane %v318_v25, 6  ;;  %v737_v16 = vrot.slane %v323_v31, 5  ;;  %v579_v9 = vsel %vm2021_vm8, %v1587_v15, %v578_v61 }
  0x33   : > { %1716 = vmatmul.mubr.msk.bf16.vlgmr.msra.gmra.mxu1 %vm367_vm1, %v1602_v54  ;;  %v1592_v3 = vcombine.low %v572_v53, %v575_v59  ;;  %v725_v0 = vrot.slane %v724_v1, 4  ;;  %v728_v20 = vor.u32 %v727_v8, %v726_v7  ;;  %v582_v26 = vsel %vm2021_vm8, %v580_v57, %v581_v56 }
  0x34   : > { %v733_v30 = vrot.slane %v731_v63, 5  ;;  %v738_v35 = vrot.slane %v326_v32, 6  ;;  %v741_v25 = vrot.slane %v336_v36, 5  ;;  %v742_v21 = vrot.slane %v332_v33, 6 }
  0x35   : > { %1706 = vmatmul.mubr.msk.bf16.vlgmr.msra.gmra.mxu0 %vm367_vm1, %v1591_v46  ;;  %v729_v31 = vsel %vm2047_vm9, %v725_v0, %v728_v20  ;;  %v730_v39 = vrot.slane %v728_v20, 4  ;;  %v746_v22 = vshrl.u32 %v1982_v17, 16  ;;  %v749_v32 = vrot.slane %v342_v37, 6 }
  0x36   : > { %1709 = vmatprep.mubr.msk.bf16.mxu0 %vm367_vm1, %v1592_v3  ;;  %v735_v47 = vor.u32 %v734_v13, %v733_v30  ;;  %v739_v40 = vor.u32 %v738_v35, %v737_v16  ;;  %1724 = vmatpush3.bf16.msra.mxu0 %v1987_v18  ;;  %v1610_v36 = vrot.slane %v1887_v4, 10  ;;  %v1593_v41 = vcombine.low %v579_v9, %v582_v26 }
  0x37   : > { %v743_v42 = vor.u32 %v742_v21, %v741_v25  ;;  %v748_v44 = vrot.slane %v746_v22, 5  ;;  %v863_v45 = vrot.slane %v1890_v5, 6  ;;  %v866_v37 = vrot.slane %v1893_v6, 6 }
  0x38   : > { %v736_v2 = vsel %vm2047_vm9, %v730_v39, %v735_v47  ;;  %v740_v48 = vrot.slane %v739_v40, 4  ;;  %v870_v18 = vrot.slane %v1907_v19, 6  ;;  %v1611_v29 = vrot.slane %v1900_v11, 10 }
  0x39   : > { %v1603_v4 = vcombine.low %v729_v31, %v736_v2  ;;  %v745_v23 = vrot.slane %v743_v42, 4  ;;  %v750_v27 = vor.u32 %v749_v32, %v748_v44  ;;  %v864_v49 = vsel %vm2124_vm12, %v1610_v36, %v863_v45 }
  0x3a   : > { %v744_v46 = vsel %vm2047_vm9, %v740_v48, %v743_v42  ;;  %v865_v5 = vrot.slane %v863_v45, 4  ;;  %v872_v50 = vrot.slane %v870_v18, 4  ;;  %v873_v19 = vrot.slane %v1917_v24, 6 }
  0x3b   : > { %1719 = vmatprep.mubr.msk.bf16.mxu1 %vm367_vm1, %v1603_v4  ;;  %v751_v6 = vsel %vm2047_vm9, %v745_v23, %v750_v27  ;;  %v1612_v54 = vrot.slane %v1934_v38, 10  ;;  %v877_v58 = vrot.slane %v1937_v43, 6  ;;  %v880_v61 = vrot.slane %v1958_v62, 6 }
  0x3c   : > { %v1604_v11 = vcombine.low %v744_v46, %v751_v6  ;;  %v867_v60 = vsel %vm2124_vm12, %v865_v5, %v866_v37  ;;  %v871_v34 = vsel %vm2124_vm12, %v1611_v29, %v870_v18  ;;  %v874_v24 = vsel %vm2124_vm12, %v872_v50, %v873_v19 }
  0x3d   : > { %1710 = vmatmul.mubr.msk.bf16.gmra.mxu0 %vm367_vm1, %v1593_v41  ;;  %v1616_v14 = vcombine.low %v864_v49, %v867_v60  ;;  %v879_v15 = vrot.slane %v877_v58, 4  ;;  %v884_v38 = vrot.slane %v1973_v12, 6  ;;  %v878_v43 = vsel %vm2124_vm12, %v1612_v54, %v877_v58 }
  0x3e   : > { %1720 = vmatmul.mubr.msk.bf16.gmra.mxu1 %vm367_vm1, %v1604_v11  ;;  %v1617_v51 = vcombine.low %v871_v34, %v874_v24  ;;  %v1613_v52 = vrot.slane %v1970_v10, 10  ;;  %v887_v55 = vrot.slane %v1982_v17, 6  ;;  %v1815_v1 = vmov 0.0  }
  0x3f   : > { %1725 = vmatprep.mubr.msk.bf16.mxu0 %vm367_vm1, %v1616_v14  ;;  %v881_v62 = vsel %vm2124_vm12, %v879_v15, %v880_v61  ;;  %v886_v53 = vrot.slane %v884_v38, 4  ;;  %1745 = vmatprep.subr.bf16.mxu0 %v1815_v1  ;;  %v2174_v49 = vstv %s995_s11  ;;  %vm1055_vm0 = vcmask 121856  }
  0x40   : > { %v1618_v28 = vcombine.low %v878_v43, %v881_v62  ;;  %v885_v12 = vsel %vm2124_vm12, %v1613_v52, %v884_v38  ;;  %1733 = vmatprep.subr.bf16.mxu1 %v1815_v1  ;;  %1735 = vmatprep.mubr.msk.bf16.mxu1 %vm1816_vm13, %v1815_v1  ;;  %vm1123_vm2 = vcmask 1045504   ;;  %vm1118_vm3 = vcmask 89088  }
  0x41   : > { %v888_v56 = vsel %vm2124_vm12, %v886_v53, %v887_v55  ;;  %vm1170_vm4 = vcmask 44032  }
  0x42   : > { %v1619_v57 = vcombine.low %v885_v12, %v888_v56 }
  0x45   : > { %1726 = vmatmul.mubr.msk.bf16.vlgmr.msra.gmra.mxu0 %vm367_vm1, %v1617_v51 }
  0x46   : > { %1729 = vmatprep.mubr.msk.bf16.mxu0 %vm367_vm1, %v1618_v28 }
  0x4d   : > { %1730 = vmatmul.mubr.msk.bf16.gmra.mxu0 %vm367_vm1, %v1619_v57  ;;  %vm1122_vm1 = vcmask 1044480  }
  0x4e   : > { %1747 = vmatprep.mubr.msk.bf16.mxu0 %vm1816_vm13, %v1815_v1 }
  0xdd   : > { %v1697_v10 = vpop.f32.mrf.mxu1 }
  0xdf   : > { %v517_v17 = vpop.f32.mrf.mxu1 }
  0xe1   : > { %v1687_v7 = vpop.f32.mrf.mxu0  ;;  %v1698_v8 = vpop.f32.mrf.mxu1 }
  0xe2   : > { %v526_v41 = vadd.f32 %v1697_v10, %v1687_v7 }
  0xe3   : > { %v414_v59 = vpop.f32.mrf.mxu0  ;;  %v520_v63 = vpop.f32.mrf.mxu1 }
  0xe4   : > { %v518_v33 = vadd.f32 %v517_v17, %v414_v59 }
  0xe5   : > { %v1688_v13 = vpop.f32.mrf.mxu0 }
  0xe6   : > { %v1701_v16 = vpop.f32.mrf.mxu1  ;;  %v529_v48 = vadd.f32 %v1698_v8, %v1688_v13 }
  0xe7   : > { %v417_v3 = vpop.f32.mrf.mxu0 }
  0xe8   : > { %v533_v9 = vpop.f32.mrf.mxu1  ;;  %v521_v23 = vadd.f32 %v520_v63, %v417_v3 }
  0xea   : > { %v1702_v20 = vpop.f32.mrf.mxu1 }
  0xec   : > { %v536_v35 = vpop.f32.mrf.mxu1 }
  0xed   : > { %v1691_v0 = vpop.f32.mrf.mxu0 }
  0xee   : > { %v542_v5 = vadd.f32 %v1701_v16, %v1691_v0 }
  0xef   : > { %v430_v26 = vpop.f32.mrf.mxu0 }
  0xf0   : > { %v534_v58 = vadd.f32 %v533_v9, %v430_v26 }
  0xf1   : > { %v1692_v30 = vpop.f32.mrf.mxu0 }
  0xf2   : > { %v545_v28 = vadd.f32 %v1702_v20, %v1692_v30 }
  0xf3   : > { %v433_v25 = vpop.f32.mrf.mxu0  ;;  %v1717_v31 = vpop.f32.mrf.mxu1 }
  0xf4   : > { %v537_v52 = vadd.f32 %v536_v35, %v433_v25 }
  0xf5   : > { %v1707_v39 = vpop.f32.mrf.mxu0  ;;  %v819_v21 = vpop.f32.mrf.mxu1 }
  0xf6   : > { %v683_v45 = vadd.f32 %v1707_v39, %v526_v41 }
  0xf7   : > { %v650_v22 = vpop.f32.mrf.mxu0  ;;  %v1718_v40 = vpop.f32.mrf.mxu1 }
  0xf8   : > { %v681_v37 = vadd.f32 %v650_v22, %v518_v33  ;;  %v852_v27 = vadd.f32 %v1717_v31, %v683_v45 }
  0xf9   : > { %v1708_v47 = vpop.f32.mrf.mxu0  ;;  %v822_v42 = vpop.f32.mrf.mxu1 }
  0xfa   : > { %v684_v29 = vadd.f32 %v1708_v47, %v529_v48  ;;  %v850_v50 = vadd.f32 %v819_v21, %v681_v37  ;;  %v1817_v21 = vmov 65535  }
  0xfb   : > { %v653_v32 = vpop.f32.mrf.mxu0  ;;  %v1060_v22 = vsel %vm1021_vm14, 4294967295, %v1817_v21 }
  0xfc   : > { %v682_v6 = vadd.f32 %v653_v32, %v521_v23  ;;  %v853_v60 = vadd.f32 %v1718_v40, %v684_v29  ;;  %v1061_v37 = vsel %vm1059_vm15, %v1060_v22, 0 }
  0xfd   : > { %v1711_v36 = vpop.f32.mrf.mxu0 }
  0xfe   : > { %v1721_v18 = vpop.f32.mrf.mxu1  ;;  %v687_v61 = vadd.f32 %v1711_v36, %v542_v5  ;;  %v851_v38 = vadd.f32 %v822_v42, %v682_v6 }
  0xff   : > { %v666_v44 = vpop.f32.mrf.mxu0 }
 0x100   : > { %v835_v19 = vpop.f32.mrf.mxu1  ;;  %v685_v34 = vadd.f32 %v666_v44, %v534_v58  ;;  %v856_v55 = vadd.f32 %v1721_v18, %v687_v61 }
 0x101   : > { %v1712_v2 = vpop.f32.mrf.mxu0 }
 0x102   : > { %v1722_v43 = vpop.f32.mrf.mxu1  ;;  %v688_v10 = vadd.f32 %v1712_v2, %v545_v28  ;;  %v854_v17 = vadd.f32 %v835_v19, %v685_v34 }
 0x103   : > { %v669_v4 = vpop.f32.mrf.mxu0 }
 0x104   : > { %v686_v7 = vadd.f32 %v669_v4, %v537_v52  ;;  %v838_v59 = vpop.f32.mrf.mxu1  ;;  %v857_v35 = vadd.f32 %v1722_v43, %v688_v10 }
 0x105   : > { %v1727_v46 = vpop.f32.mrf.mxu0 }
 0x106   : > { %v989_v54 = vadd.f32 %v1727_v46, %v852_v27  ;;  %v855_v25 = vadd.f32 %v838_v59, %v686_v7 }
 0x107   : > { %v956_v11 = vpop.f32.mrf.mxu0 }
 0x108   : > { %v999_v14 = vadd.f32 %v2174_v49, %v989_v54  ;;  %v987_v15 = vadd.f32 %v956_v11, %v850_v50 }
 0x109   : > { %v1728_v24 = vpop.f32.mrf.mxu0 }
 0x10a   : > { %v997_v62 = vadd.f32 %v2174_v49, %v987_v15  ;;  %v990_v51 = vadd.f32 %v1728_v24, %v853_v60  ;;  %v1007_v12 = vmax.f32 %v999_v14, 0.0  ;;  %v1172_v60 = vld [vmem:[%s2254_s3] sm:$0xf] }
 0x10b   : > { %v959_v53 = vpop.f32.mrf.mxu0 }
 0x10c   : > { %v1000_v56 = vadd.f32 %v2174_v49, %v990_v51  ;;  %v988_v57 = vadd.f32 %v959_v53, %v851_v38  ;;  %v1005_v63 = vmax.f32 %v997_v62, 0.0  ;;  %v1025_v0 = vrot.slane %v1007_v12, 1  ;;  %v1281_v53 = vld [vmem:[%s2254_s3] sm:$0xf] }
 0x10d   : > { %v1731_v8 = vpop.f32.mrf.mxu0 }
 0x10e   : > { %v1008_v13 = vmax.f32 %v1000_v56, 0.0  ;;  %v998_v16 = vadd.f32 %v2174_v49, %v988_v57  ;;  %v993_v3 = vadd.f32 %v1731_v8, %v856_v55  ;;  %v1022_v47 = vrot.slane %v1005_v63, 1  ;;  %v1803_v56 = vld [vmem:[%s2255_s4] sm:$0x3f]  }
 0x10f   : > { %v972_v9 = vpop.f32.mrf.mxu0  ;;  %v1124_v57 = vsel %vm1122_vm1, 4294967295, %v1817_v21  ;;  %v1804_v21 = vld [vmem:[%s2255_s4] sm:$0x3f]  }
 0x110   : > { %v1026_v20 = vrot.slane %v1008_v13, 1  ;;  %v1006_v26 = vmax.f32 %v998_v16, 0.0  ;;  %v991_v30 = vadd.f32 %v972_v9, %v854_v17  ;;  %v1003_v31 = vadd.f32 %v2174_v49, %v993_v3 }
 0x111   : > { %v1732_v39 = vpop.f32.mrf.mxu0  ;;  %v1125_v10 = vsel %vm1123_vm2, %v1124_v57, 0 }
 0x112   : > { %v1027_v40 = vsel %vm1021_vm14, %v1025_v0, %v1026_v20  ;;  %v1045_v32 = vmax.f32 %v1008_v13, %v1026_v20  ;;  %v1023_v36 = vrot.slane %v1006_v26, 1  ;;  %v1001_v42 = vadd.f32 %v2174_v49, %v991_v30 }
 0x113   : > { %v1044_v41 = vmax.f32 %v1007_v12, %v1027_v40  ;;  %v994_v44 = vadd.f32 %v1732_v39, %v857_v35  ;;  %v975_v33 = vpop.f32.mrf.mxu0  ;;  %v1011_v23 = vmax.f32 %v1003_v31, 0.0  ;;  %v1390_v12 = vld [vmem:[%s2254_s3] sm:$0xf]  ;;  %v1127_v17 = vand.u32 %v1803_v56, %v1125_v10 }
 0x114   : > { %v1024_v45 = vsel %vm1021_vm14, %v1022_v47, %v1023_v36  ;;  %v1043_v2 = vmax.f32 %v1006_v26, %v1023_v36  ;;  %v992_v48 = vadd.f32 %v975_v33, %v855_v25  ;;  %v1009_v29 = vmax.f32 %v1001_v42, 0.0 }
 0x115   : > { %v1051_v18 = vpack.c.bf16 %v1045_v32, %v1044_v41  ;;  %v1042_v4 = vmax.f32 %v1005_v63, %v1024_v45  ;;  %v1004_v27 = vadd.f32 %v2174_v49, %v994_v44  ;;  %v1031_v54 = vrot.slane %v1011_v23, 1  ;;  %v1805_v41 = vld [vmem:[%s2255_s4] sm:$0x3f]  }
 0x116   : > { %v1002_v46 = vadd.f32 %v2174_v49, %v992_v48  ;;  %v1028_v61 = vrot.slane %v1009_v29, 1  ;;  %v1054_v49 = vld [vmem:[%s2254_s3] sm:$0xf]  ;;  %v1236_v40 = vand.u32 %v1804_v21, %v1125_v10  ;;  %v1345_v44 = vand.u32 %v1805_v41, %v1125_v10 }
 0x117   : > { %v1050_v5 = vpack.c.bf16 %v1043_v2, %v1042_v4  ;;  %v1012_v50 = vmax.f32 %v1004_v27, 0.0  ;;  %v1177_v6 = vand.u32 %v1061_v37, %v1051_v18  ;;  %v1806_v2 = vld [vmem:[%s2255_s4] sm:$0x3f]  }
 0x118   : > { %v1010_v19 = vmax.f32 %v1002_v46, 0.0 }
 0x119   : > { %v1032_v58 = vrot.slane %v1012_v50, 1  ;;  %1746 = vmatpush3.bf16.msra.mxu0 %v1177_v6  ;;  %v1063_v11 = vand.u32 %v1061_v37, %v1050_v5 }
 0x11a   : > { %v1029_v14 = vrot.slane %v1010_v19, 1  ;;  %1757 = vmatprep.subr.bf16.mxu0 %v1815_v1 }
 0x11b   : > { %v1033_v15 = vsel %vm1021_vm14, %v1031_v54, %v1032_v58  ;;  %1734 = vmatpush3.bf16.msra.mxu1 %v1063_v11  ;;  %v1049_v43 = vmax.f32 %v1012_v50, %v1032_v58 }
 0x11c   : > { %v1030_v34 = vsel %vm1021_vm14, %v1028_v61, %v1029_v14  ;;  %v1047_v24 = vmax.f32 %v1010_v19, %v1029_v14  ;;  %1748 = vmatmul.mubr.msk.bf16.vlgmr.msra.gmra.mxu0 %vm1055_vm0, %v1172_v60  ;;  %1739 = vmatprep.subr.bf16.mxu1 %v1815_v1  ;;  %v1048_v38 = vmax.f32 %v1011_v23, %v1033_v15 }
 0x11d   : > { %v1046_v62 = vmax.f32 %v1009_v29, %v1030_v34  ;;  %1759 = vmatprep.mubr.msk.bf16.mxu0 %vm1816_vm13, %v1815_v1 }
 0x11e   : > { %1736 = vmatmul.mubr.msk.bf16.vlgmr.msra.gmra.mxu1 %vm1055_vm0, %v1054_v49  ;;  %v1053_v28 = vpack.c.bf16 %v1049_v43, %v1048_v38 }
 0x11f   : > { %v1052_v51 = vpack.c.bf16 %v1047_v24, %v1046_v62  ;;  %1741 = vmatprep.mubr.msk.bf16.mxu1 %vm1816_vm13, %v1815_v1  ;;  %1740 = vmatpush3.bf16.msra.mxu1 %v1127_v17 }
 0x120   : > { %v1395_v55 = vand.u32 %v1061_v37, %v1053_v28  ;;  %1751 = vmatprep.subr.bf16.mxu1 %v1815_v1 }
 0x121   : > { %v1286_v52 = vand.u32 %v1061_v37, %v1052_v51  ;;  %v1454_v37 = vand.u32 %v1806_v2, %v1125_v10 }
 0x123   : > { %1758 = vmatpush3.bf16.msra.mxu0 %v1286_v52 }
 0x124   : > { %1769 = vmatprep.subr.bf16.mxu0 %v1815_v1 }
 0x126   : > { %1760 = vmatmul.mubr.msk.bf16.vlgmr.msra.gmra.mxu0 %vm1055_vm0, %v1281_v53 }
 0x127   : > { %1770 = vmatpush3.bf16.msra.mxu0 %v1395_v55  ;;  %1771 = vmatprep.mubr.msk.bf16.mxu0 %vm1816_vm13, %v1815_v1 }
 0x12e   : > { %1772 = vmatmul.mubr.msk.bf16.vlgmr.msra.gmra.mxu0 %vm1055_vm0, %v1390_v12 }
 0x1dc   : > { %v1213_v7 = vpop.f32.mrf.mxu0 }
 0x1de   : > { %v1099_v8 = vpop.f32.mrf.mxu1  ;;  %v1749_v59 = vpop.f32.mrf.mxu0 }
 0x1df   : > { %1106 = vrot.lane.b32.xlu0 %v1099_v8, %s1818_s23 }
 0x1e0   : > { %v1216_v63 = vpop.f32.mrf.mxu0  ;;  %v1737_v13 = vpop.f32.mrf.mxu1 }
 0x1e2   : > { %v1750_v16 = vpop.f32.mrf.mxu0  ;;  %v1102_v3 = vpop.f32.mrf.mxu1 }
 0x1e3   : > { %1220 = vrot.lane.b32.xlu0 %v1213_v7, %s1818_s23 }
 0x1e4   : > { %v1738_v9 = vpop.f32.mrf.mxu1 }
 0x1e6   : > { %v1322_v0 = vpop.f32.mrf.mxu0 }
 0x1e7   : > { %1329 = vrot.lane.b32.xlu1 %v1322_v0, %s1818_s23 }
 0x1e8   : > { %v1761_v20 = vpop.f32.mrf.mxu0 }
 0x1ea   : > { %v1325_v26 = vpop.f32.mrf.mxu0 }
 0x1ec   : > { %v1762_v30 = vpop.f32.mrf.mxu0 }
 0x1ee   : > { %v1431_v35 = vpop.f32.mrf.mxu0 }
 0x1ef   : > { %1438 = vrot.lane.b32.xlu1 %v1431_v35, %s1818_s23 }
 0x1f0   : > { %v1773_v25 = vpop.f32.mrf.mxu0 }
 0x1f2   : > { %v1434_v31 = vpop.f32.mrf.mxu0 }
 0x1f4   : > { %v1774_v39 = vpop.f32.mrf.mxu0 }
 0x251   : > { %v1107_v22 = vpop.permute.xlu0 %1106 }
 0x252   : > { %v1109_v47 = vmax.f32 %v1099_v8, %v1107_v22 }
 0x254   : > { %v1110_v32 = vpack.c.bf16 %v1109_v47, %v1109_v47 }
 0x255   : > { %v1221_v36 = vpop.permute.xlu0 %1220 }
 0x256   : > { %1742 = vmatmul.mubr.msk.bf16.vlgmr.msra.gmra.mxu1 %vm1118_vm3, %v1110_v32  ;;  %v1223_v42 = vmax.f32 %v1213_v7, %v1221_v36 }
 0x257   : > { %1752 = vmatpush3.bf16.msra.mxu1 %v1236_v40  ;;  %1753 = vmatprep.mubr.msk.bf16.mxu1 %vm1816_vm13, %v1815_v1 }
 0x258   : > { %1763 = vmatprep.subr.bf16.mxu1 %v1815_v1  ;;  %v1224_v33 = vpack.c.bf16 %v1223_v42, %v1223_v42 }
 0x259   : > { %v1330_v45 = vpop.permute.xlu1 %1329 }
 0x25a   : > { %v1332_v48 = vmax.f32 %v1322_v0, %v1330_v45 }
 0x25c   : > { %v1333_v18 = vpack.c.bf16 %v1332_v48, %v1332_v48 }
 0x25e   : > { %1754 = vmatmul.mubr.msk.bf16.vlgmr.msra.gmra.mxu1 %vm1118_vm3, %v1224_v33 }
 0x25f   : > { %1764 = vmatpush3.bf16.msra.mxu1 %v1345_v44  ;;  %1765 = vmatprep.mubr.msk.bf16.mxu1 %vm1816_vm13, %v1815_v1 }
 0x260   : > { %1775 = vmatprep.subr.bf16.mxu1 %v1815_v1 }
 0x261   : > { %v1439_v4 = vpop.permute.xlu1 %1438 }
 0x262   : > { %v1441_v23 = vmax.f32 %v1431_v35, %v1439_v4 }
 0x264   : > { %v1442_v27 = vpack.c.bf16 %v1441_v23, %v1441_v23 }
 0x266   : > { %1766 = vmatmul.mubr.msk.bf16.vlgmr.msra.gmra.mxu1 %vm1118_vm3, %v1333_v18 }
 0x267   : > { %1776 = vmatpush3.bf16.msra.mxu1 %v1454_v37  ;;  %1777 = vmatprep.mubr.msk.bf16.mxu1 %vm1816_vm13, %v1815_v1 }
 0x26e   : > { %1778 = vmatmul.mubr.msk.bf16.vlgmr.msra.gmra.mxu1 %vm1118_vm3, %v1442_v27 }
 0x316   : > { %v1163_v29 = vpop.f32.mrf.mxu1 }
 0x317   : > { %v1169_v46 = vpack.c.bf16 %v1163_v29, %v1163_v29 }
 0x318   : > { %v1743_v5 = vpop.f32.mrf.mxu1 }
 0x319   : > { %1171 = vst.msk [vmem:[%s230_s8] sm:$0xf] %vm1170_vm4, %v1169_v46 }
 0x31a   : > { %v1166_v50 = vpop.f32.mrf.mxu1 }
 0x31c   : > { %v1744_v6 = vpop.f32.mrf.mxu1 }
 0x31e   : > { %v1272_v19 = vpop.f32.mrf.mxu1 }
 0x31f   : > { %v1278_v54 = vpack.c.bf16 %v1272_v19, %v1272_v19 }
 0x320   : > { %v1755_v1 = vpop.f32.mrf.mxu1 }
 0x321   : > { %1631 = vst.msk [vmem:[%s230_s8 + $0x4] sm:$0xf] %vm1170_vm4, %v1278_v54 }
 0x322   : > { %v1275_v58 = vpop.f32.mrf.mxu1 }
 0x324   : > { %v1756_v11 = vpop.f32.mrf.mxu1 }
 0x326   : > { %v1381_v60 = vpop.f32.mrf.mxu1 }
 0x327   : > { %v1387_v61 = vpack.c.bf16 %v1381_v60, %v1381_v60 }
 0x328   : > { %v1767_v14 = vpop.f32.mrf.mxu1 }
 0x329   : > { %1635 = vst.msk [vmem:[%s230_s8 + $0x8] sm:$0xf] %vm1170_vm4, %v1387_v61 }
 0x32a   : > { %v1384_v15 = vpop.f32.mrf.mxu1 }
 0x32c   : > { %v1768_v49 = vpop.f32.mrf.mxu1 }
 0x32e   : > { %v1490_v34 = vpop.f32.mrf.mxu1 }
 0x32f   : > { %v1496_v24 = vpack.c.bf16 %v1490_v34, %v1490_v34 }
 0x330   : > { %v1779_v38 = vpop.f32.mrf.mxu1 }
 0x331   : > { %1639 = vst.msk [vmem:[%s230_s8 + $0xc] sm:$0xf] %vm1170_vm4, %v1496_v24 }
 0x332   : > { %v1493_v43 = vpop.f32.mrf.mxu1 }
 0x334   : > { %v1780_v62 = vpop.f32.mrf.mxu1 }
 0x335 PF: > { %s16_s20 = sadd.s32 1, %s1813_s20  }
 0x336   : > { %p13_p4 = scmp.ge.s32.totalorder %s16_s20, 4  }
 0x338   :  { %15 = sbr.rel (!%p13_p4) target bundleno = 2 (0x2), region = 77 }

</bundles_post_ra>
